<compile_context>
chip_gen: v5e
topology: v5e:2x2
jax: 0.10.0
libtpu: 0.0.40
codegen_flags: <defaults>
</compile_context>

<pallas_src>
import functools
import math

import numpy as np
import jax
import jax.numpy as jnp
from jax import lax
from jax.experimental import pallas as pl
from jax.experimental.pallas import tpu as pltpu


# ----------------------------------------------------------------------------
# Fused kernel (one grid step = one batch image):
#   x_ref:    (H*W, Cin)   bf16   flattened input image
#   w1_ref:   (Cin, C_tot) bf16   1x1 weights, BN scale folded, columns = [x1 | x1 replicated]
#   b1_ref:   (1, C_tot)   f32    folded BN bias for the columns above
#   wdw_ref:  (9, C_tot)   f32    depthwise taps (tap k = dy*3+dx); identity taps for first init_c
#   b2_ref:   (1, C_tot)   f32    depthwise BN bias (0 for the identity channels)
#   o_ref:    (H, W, oup)  f32    final GhostModule output tile
#   ypad_scr: (H+2, W+2, C_tot) f32 VMEM scratch, zero-padded halo for the 3x3 conv
# ----------------------------------------------------------------------------
def ghost_fused_kernel(x_ref, w1_ref, b1_ref, wdw_ref, b2_ref, o_ref, ypad_scr,
                       *, H, W, C_tot, oup):
    # Primary 1x1 conv on the MXU (bf16 in, f32 accumulate), bias + ReLU fused.
    y = jnp.dot(x_ref[...], w1_ref[...], preferred_element_type=jnp.float32)
    y = jnp.maximum(y + b1_ref[...], 0.0)                       # (H*W, C_tot) f32

    # Stage into the zero-padded VMEM scratch (halo of 1 for the 3x3 depthwise).
    # Zero every step (scratch is per-core; do not rely on program_id==0 init under
    # megacore "parallel" sharding).
    ypad_scr[...] = jnp.zeros_like(ypad_scr)
    ypad_scr[1:H + 1, 1:W + 1, :] = y.reshape(H, W, C_tot)

    # Depthwise 3x3 + bias + ReLU on the VPU (f32).  Identity taps on the first init_c
    # channels make this pass emit concat([x1, x2]) directly (ReLU is idempotent on x1 >= 0).
    w_all = wdw_ref[...]                                        # (9, C_tot)
    acc = None
    for k in range(9):                                          # static unrolled 3x3 taps
        dy, dx = divmod(k, 3)
        tap = ypad_scr[dy:dy + H, dx:dx + W, :] * w_all[k]
        acc = tap if acc is None else acc + tap
    out = jnp.maximum(acc + b2_ref[...], 0.0)                   # (H, W, C_tot)

    # Single full-width store of the sliced output.
    o_ref[...] = out[:, :, :oup].astype(o_ref.dtype)


# ----------------------------------------------------------------------------
# Wrapper
# ----------------------------------------------------------------------------
def fold_bn(gamma, beta, mean, var, eps=1e-5):
    scale = gamma / jnp.sqrt(var + eps)
    bias = beta - mean * scale
    return scale.astype(jnp.float32), bias.astype(jnp.float32)


def ghost_module_pallas(x_nchw, params, *, oup, ratio=2):
    """GhostModule forward. x_nchw: (N, Cin, H, W) float32. Returns (N, oup, H, W)."""
    N, Cin, H, W = x_nchw.shape
    init_c = math.ceil(oup / ratio)
    mult = ratio - 1
    new_c = init_c * mult
    C_tot = init_c + new_c
    assert oup <= C_tot and mult >= 1

    # ---- host-side parameter folding (tiny, one-time glue) -------------------
    s1, b1 = fold_bn(params["bn1_gamma"], params["bn1_beta"],
                     params["bn1_mean"], params["bn1_var"])
    w1 = params["w_primary"].reshape(init_c, Cin).T * s1[None, :]     # (Cin, init_c)
    rep = np.arange(new_c) // mult                                    # grouped-conv channel map
    w1_cat = jnp.concatenate([w1, w1[:, rep]], axis=1)                # (Cin, C_tot)
    b1_cat = jnp.concatenate([b1, b1[rep]]).reshape(1, C_tot)

    s2, b2 = fold_bn(params["bn2_gamma"], params["bn2_beta"],
                     params["bn2_mean"], params["bn2_var"])
    wdw = params["w_cheap"].reshape(new_c, 9).T * s2[None, :]         # (9, new_c), tap=dy*3+dx
    id_taps = jnp.zeros((9, init_c), jnp.float32).at[4, :].set(1.0)   # center-tap identity
    wdw_full = jnp.concatenate([id_taps, wdw], axis=1)                # (9, C_tot)
    b2_full = jnp.concatenate([jnp.zeros((init_c,), jnp.float32), b2]).reshape(1, C_tot)

    # ---- input layout: NCHW -> per-image flattened NHWC rows, bf16 -----------
    x_rows = jnp.transpose(x_nchw, (0, 2, 3, 1)).reshape(N, H * W, Cin).astype(jnp.bfloat16)
    w1_cat = w1_cat.astype(jnp.bfloat16)

    out_nhwc = pl.pallas_call(
        functools.partial(ghost_fused_kernel, H=H, W=W, C_tot=C_tot, oup=oup),
        out_shape=jax.ShapeDtypeStruct((N, H, W, oup), jnp.float32),
        grid_spec=pltpu.PrefetchScalarGridSpec(
            num_scalar_prefetch=0,
            grid=(N,),
            in_specs=[
                pl.BlockSpec((None, H * W, Cin), lambda n: (n, 0, 0)),
                pl.BlockSpec((Cin, C_tot), lambda n: (0, 0)),
                pl.BlockSpec((1, C_tot), lambda n: (0, 0)),
                pl.BlockSpec((9, C_tot), lambda n: (0, 0)),
                pl.BlockSpec((1, C_tot), lambda n: (0, 0)),
            ],
            out_specs=pl.BlockSpec((None, H, W, oup), lambda n: (n, 0, 0, 0)),
            scratch_shapes=[pltpu.VMEM((H + 2, W + 2, C_tot), jnp.float32)],
        ),
        compiler_params=pltpu.CompilerParams(
            dimension_semantics=("parallel",),
        ),
    )(x_rows, w1_cat, b1_cat, wdw_full, b2_full)

    return jnp.transpose(out_nhwc, (0, 3, 1, 2)).astype(x_nchw.dtype)   # NHWC -> NCHW


# ----------------------------------------------------------------------------
# Pure-JAX reference (mirrors the PyTorch module in NCHW)
# ----------------------------------------------------------------------------
def ghost_module_ref(x, params, *, oup, ratio=2, eps=1e-5):
    init_c = math.ceil(oup / ratio)

    def bn(y, g, b, m, v):
        return (y - m[None, :, None, None]) / jnp.sqrt(v[None, :, None, None] + eps) \
               * g[None, :, None, None] + b[None, :, None, None]

    x1 = lax.conv_general_dilated(x, params["w_primary"], (1, 1), ((0, 0), (0, 0)),
                                  dimension_numbers=("NCHW", "OIHW", "NCHW"))
    x1 = jnp.maximum(bn(x1, params["bn1_gamma"], params["bn1_beta"],
                        params["bn1_mean"], params["bn1_var"]), 0.0)
    x2 = lax.conv_general_dilated(x1, params["w_cheap"], (1, 1), ((1, 1), (1, 1)),
                                  dimension_numbers=("NCHW", "OIHW", "NCHW"),
                                  feature_group_count=init_c)
    x2 = jnp.maximum(bn(x2, params["bn2_gamma"], params["bn2_beta"],
                        params["bn2_mean"], params["bn2_var"]), 0.0)
    out = jnp.concatenate([x1, x2], axis=1)
    return out[:, :oup, :, :]


# ----------------------------------------------------------------------------
def make_params(key, inp, oup, ratio):
    init_c = math.ceil(oup / ratio)
    new_c = init_c * (ratio - 1)
    ks = jax.random.split(key, 10)
    return {
        "w_primary": 0.1 * jax.random.normal(ks[0], (init_c, inp, 1, 1), jnp.float32),
        "bn1_gamma": 1.0 + 0.1 * jax.random.normal(ks[1], (init_c,), jnp.float32),
        "bn1_beta":  0.05 * jax.random.normal(ks[2], (init_c,), jnp.float32),
        "bn1_mean":  0.1 * jax.random.normal(ks[3], (init_c,), jnp.float32),
        "bn1_var":   jax.random.uniform(ks[4], (init_c,), jnp.float32, 0.5, 1.5),
        "w_cheap":   0.1 * jax.random.normal(ks[5], (new_c, 1, 3, 3), jnp.float32),
        "bn2_gamma": 1.0 + 0.1 * jax.random.normal(ks[6], (new_c,), jnp.float32),
        "bn2_beta":  0.05 * jax.random.normal(ks[7], (new_c,), jnp.float32),
        "bn2_mean":  0.1 * jax.random.normal(ks[8], (new_c,), jnp.float32),
        "bn2_var":   jax.random.uniform(ks[9], (new_c,), jnp.float32, 0.5, 1.5),
    }


if __name__ == "__main__":
    key = jax.random.PRNGKey(0)
    k_p1, k_p2, k_x1, k_x2 = jax.random.split(key, 4)

    # Case 1: module defaults (ratio=2), oup not a multiple of ratio (exercises the slice).
    N, inp, H, W = 2, 4, 16, 16
    oup, ratio = 7, 2
    params = make_params(k_p1, inp, oup, ratio)
    x = jax.random.normal(k_x1, (N, inp, H, W), jnp.float32)

    out = jax.block_until_ready(ghost_module_pallas(x, params, oup=oup, ratio=ratio))
    ref = jax.block_until_ready(ghost_module_ref(x, params, oup=oup, ratio=ratio))
    assert out.shape == (N, oup, H, W), out.shape
    err = jnp.max(jnp.abs(out - ref))
    assert jnp.allclose(out, ref, rtol=2e-2, atol=2e-2), f"case1 max abs err = {err}"

    # Case 2: ratio=3 (exercises the grouped-conv channel replication path, mult=2).
    oup2, ratio2 = 6, 3
    params2 = make_params(k_p2, inp, oup2, ratio2)
    x2 = jax.random.normal(k_x2, (N, inp, H, W), jnp.float32)

    out2 = jax.block_until_ready(ghost_module_pallas(x2, params2, oup=oup2, ratio=ratio2))
    ref2 = jax.block_until_ready(ghost_module_ref(x2, params2, oup=oup2, ratio=ratio2))
    assert out2.shape == (N, oup2, H, W), out2.shape
    err2 = jnp.max(jnp.abs(out2 - ref2))
    assert jnp.allclose(out2, ref2, rtol=2e-2, atol=2e-2), f"case2 max abs err = {err2}"

    print("KERNEL_OK")
</pallas_src>

<mosaic_0001>
module attributes {stable_mosaic.version = 11 : i64} {
  func.func @ghost_fused_kernel(%arg0: i32, %arg1: memref<1x256x4xbf16, #tpu.memory_space<vmem>>, %arg2: memref<4x8xbf16, #tpu.memory_space<vmem>>, %arg3: memref<1x8xf32, #tpu.memory_space<vmem>>, %arg4: memref<9x8xf32, #tpu.memory_space<vmem>>, %arg5: memref<1x8xf32, #tpu.memory_space<vmem>>, %arg6: memref<1x16x16x7xf32, #tpu.memory_space<vmem>>, %arg7: memref<18x18x8xf32, #tpu.memory_space<vmem>>) attributes {dimension_semantics = [#tpu.dimension_semantics<parallel>], iteration_bounds = array<i64: 2>, scalar_prefetch = 0 : i64, scratch_operands = 1 : i64, tpu.core_type = #tpu.core_type<tc>, window_params = [{transform_indices = @transform_0, window_bounds = array<i64: 1, 256, 4>}, {pipeline_mode = #tpu.pipeline_mode<synchronous>, transform_indices = @transform_1, window_bounds = array<i64: 4, 8>}, {pipeline_mode = #tpu.pipeline_mode<synchronous>, transform_indices = @transform_2, window_bounds = array<i64: 1, 8>}, {pipeline_mode = #tpu.pipeline_mode<synchronous>, transform_indices = @transform_3, window_bounds = array<i64: 9, 8>}, {pipeline_mode = #tpu.pipeline_mode<synchronous>, transform_indices = @transform_4, window_bounds = array<i64: 1, 8>}, {transform_indices = @transform_5, window_bounds = array<i64: 1, 16, 16, 7>}]} {
    %c0 = arith.constant 0 : index
    %c0_0 = arith.constant 0 : index
    %c0_1 = arith.constant 0 : index
    %0 = vector.load %arg1[%c0, %c0_0, %c0_1] : memref<1x256x4xbf16, #tpu.memory_space<vmem>>, vector<1x256x4xbf16>
    %1 = vector.shape_cast %0 : vector<1x256x4xbf16> to vector<256x4xbf16>
    %c0_2 = arith.constant 0 : index
    %c0_3 = arith.constant 0 : index
    %2 = vector.load %arg2[%c0_2, %c0_3] : memref<4x8xbf16, #tpu.memory_space<vmem>>, vector<4x8xbf16>
    %cst = arith.constant dense<0.000000e+00> : vector<256x8xf32>
    %3 = tpu.matmul %1, %2, %cst {dimension_numbers = #tpu.dot_dimension_numbers<[1], [0], [0], [1], [0, 0, 1, 1], [], []>} : vector<256x4xbf16>, vector<4x8xbf16>, vector<256x8xf32> -> vector<256x8xf32>
    %c0_4 = arith.constant 0 : index
    %c0_5 = arith.constant 0 : index
    %4 = vector.load %arg3[%c0_4, %c0_5] : memref<1x8xf32, #tpu.memory_space<vmem>>, vector<1x8xf32>
    %5 = vector.broadcast %4 : vector<1x8xf32> to vector<256x8xf32>
    %6 = arith.addf %3, %5 : vector<256x8xf32>
    %cst_6 = arith.constant 0.000000e+00 : f32
    %7 = vector.broadcast %cst_6 : f32 to vector<256x8xf32>
    %8 = arith.maximumf %6, %7 : vector<256x8xf32>
    %cst_7 = arith.constant 0.000000e+00 : f32
    %9 = vector.broadcast %cst_7 : f32 to vector<18x18x8xf32>
    %c0_8 = arith.constant 0 : index
    %c0_9 = arith.constant 0 : index
    %c0_10 = arith.constant 0 : index
    %10 = vector.load %arg7[%c0_8, %c0_9, %c0_10] : memref<18x18x8xf32, #tpu.memory_space<vmem>>, vector<18x18x8xf32>
    tpu.vector_store %arg7[%c0_8, %c0_9, %c0_10], %9 {strides = array<i32>} : memref<18x18x8xf32, #tpu.memory_space<vmem>>, vector<18x18x8xf32>,
    %11 = vector.shape_cast %8 : vector<256x8xf32> to vector<16x16x8xf32>
    %c1 = arith.constant 1 : index
    %c1_11 = arith.constant 1 : index
    %c0_12 = arith.constant 0 : index
    %12 = vector.load %arg7[%c1, %c1_11, %c0_12] : memref<18x18x8xf32, #tpu.memory_space<vmem>>, vector<16x16x8xf32>
    tpu.vector_store %arg7[%c1, %c1_11, %c0_12], %11 {strides = array<i32>} : memref<18x18x8xf32, #tpu.memory_space<vmem>>, vector<16x16x8xf32>,
    %c0_13 = arith.constant 0 : index
    %c0_14 = arith.constant 0 : index
    %13 = vector.load %arg4[%c0_13, %c0_14] : memref<9x8xf32, #tpu.memory_space<vmem>>, vector<9x8xf32>
    %c0_15 = arith.constant 0 : index
    %c0_16 = arith.constant 0 : index
    %c0_17 = arith.constant 0 : index
    %14 = vector.load %arg7[%c0_15, %c0_16, %c0_17] : memref<18x18x8xf32, #tpu.memory_space<vmem>>, vector<16x16x8xf32>
    %15 = vector.extract_strided_slice %13 {offsets = [0, 0], sizes = [1, 8], strides = [1, 1]} : vector<9x8xf32> to vector<1x8xf32>
    %16 = vector.shape_cast %15 : vector<1x8xf32> to vector<8xf32>
    %17 = vector.shape_cast %16 : vector<8xf32> to vector<1x1x8xf32>
    %18 = vector.broadcast %17 : vector<1x1x8xf32> to vector<16x16x8xf32>
    %19 = arith.mulf %14, %18 : vector<16x16x8xf32>
    %c0_18 = arith.constant 0 : index
    %c1_19 = arith.constant 1 : index
    %c0_20 = arith.constant 0 : index
    %20 = vector.load %arg7[%c0_18, %c1_19, %c0_20] : memref<18x18x8xf32, #tpu.memory_space<vmem>>, vector<16x16x8xf32>
    %21 = vector.extract_strided_slice %13 {offsets = [1, 0], sizes = [1, 8], strides = [1, 1]} : vector<9x8xf32> to vector<1x8xf32>
    %22 = vector.shape_cast %21 : vector<1x8xf32> to vector<8xf32>
    %23 = vector.shape_cast %22 : vector<8xf32> to vector<1x1x8xf32>
    %24 = vector.broadcast %23 : vector<1x1x8xf32> to vector<16x16x8xf32>
    %25 = arith.mulf %20, %24 : vector<16x16x8xf32>
    %26 = arith.addf %19, %25 : vector<16x16x8xf32>
    %c0_21 = arith.constant 0 : index
    %c2 = arith.constant 2 : index
    %c0_22 = arith.constant 0 : index
    %27 = vector.load %arg7[%c0_21, %c2, %c0_22] : memref<18x18x8xf32, #tpu.memory_space<vmem>>, vector<16x16x8xf32>
    %28 = vector.extract_strided_slice %13 {offsets = [2, 0], sizes = [1, 8], strides = [1, 1]} : vector<9x8xf32> to vector<1x8xf32>
    %29 = vector.shape_cast %28 : vector<1x8xf32> to vector<8xf32>
    %30 = vector.shape_cast %29 : vector<8xf32> to vector<1x1x8xf32>
    %31 = vector.broadcast %30 : vector<1x1x8xf32> to vector<16x16x8xf32>
    %32 = arith.mulf %27, %31 : vector<16x16x8xf32>
    %33 = arith.addf %26, %32 : vector<16x16x8xf32>
    %c1_23 = arith.constant 1 : index
    %c0_24 = arith.constant 0 : index
    %c0_25 = arith.constant 0 : index
    %34 = vector.load %arg7[%c1_23, %c0_24, %c0_25] : memref<18x18x8xf32, #tpu.memory_space<vmem>>, vector<16x16x8xf32>
    %35 = vector.extract_strided_slice %13 {offsets = [3, 0], sizes = [1, 8], strides = [1, 1]} : vector<9x8xf32> to vector<1x8xf32>
    %36 = vector.shape_cast %35 : vector<1x8xf32> to vector<8xf32>
    %37 = vector.shape_cast %36 : vector<8xf32> to vector<1x1x8xf32>
    %38 = vector.broadcast %37 : vector<1x1x8xf32> to vector<16x16x8xf32>
    %39 = arith.mulf %34, %38 : vector<16x16x8xf32>
    %40 = arith.addf %33, %39 : vector<16x16x8xf32>
    %c1_26 = arith.constant 1 : index
    %c1_27 = arith.constant 1 : index
    %c0_28 = arith.constant 0 : index
    %41 = vector.load %arg7[%c1_26, %c1_27, %c0_28] : memref<18x18x8xf32, #tpu.memory_space<vmem>>, vector<16x16x8xf32>
    %42 = vector.extract_strided_slice %13 {offsets = [4, 0], sizes = [1, 8], strides = [1, 1]} : vector<9x8xf32> to vector<1x8xf32>
    %43 = vector.shape_cast %42 : vector<1x8xf32> to vector<8xf32>
    %44 = vector.shape_cast %43 : vector<8xf32> to vector<1x1x8xf32>
    %45 = vector.broadcast %44 : vector<1x1x8xf32> to vector<16x16x8xf32>
    %46 = arith.mulf %41, %45 : vector<16x16x8xf32>
    %47 = arith.addf %40, %46 : vector<16x16x8xf32>
    %c1_29 = arith.constant 1 : index
    %c2_30 = arith.constant 2 : index
    %c0_31 = arith.constant 0 : index
    %48 = vector.load %arg7[%c1_29, %c2_30, %c0_31] : memref<18x18x8xf32, #tpu.memory_space<vmem>>, vector<16x16x8xf32>
    %49 = vector.extract_strided_slice %13 {offsets = [5, 0], sizes = [1, 8], strides = [1, 1]} : vector<9x8xf32> to vector<1x8xf32>
    %50 = vector.shape_cast %49 : vector<1x8xf32> to vector<8xf32>
    %51 = vector.shape_cast %50 : vector<8xf32> to vector<1x1x8xf32>
    %52 = vector.broadcast %51 : vector<1x1x8xf32> to vector<16x16x8xf32>
    %53 = arith.mulf %48, %52 : vector<16x16x8xf32>
    %54 = arith.addf %47, %53 : vector<16x16x8xf32>
    %c2_32 = arith.constant 2 : index
    %c0_33 = arith.constant 0 : index
    %c0_34 = arith.constant 0 : index
    %55 = vector.load %arg7[%c2_32, %c0_33, %c0_34] : memref<18x18x8xf32, #tpu.memory_space<vmem>>, vector<16x16x8xf32>
    %56 = vector.extract_strided_slice %13 {offsets = [6, 0], sizes = [1, 8], strides = [1, 1]} : vector<9x8xf32> to vector<1x8xf32>
    %57 = vector.shape_cast %56 : vector<1x8xf32> to vector<8xf32>
    %58 = vector.shape_cast %57 : vector<8xf32> to vector<1x1x8xf32>
    %59 = vector.broadcast %58 : vector<1x1x8xf32> to vector<16x16x8xf32>
    %60 = arith.mulf %55, %59 : vector<16x16x8xf32>
    %61 = arith.addf %54, %60 : vector<16x16x8xf32>
    %c2_35 = arith.constant 2 : index
    %c1_36 = arith.constant 1 : index
    %c0_37 = arith.constant 0 : index
    %62 = vector.load %arg7[%c2_35, %c1_36, %c0_37] : memref<18x18x8xf32, #tpu.memory_space<vmem>>, vector<16x16x8xf32>
    %63 = vector.extract_strided_slice %13 {offsets = [7, 0], sizes = [1, 8], strides = [1, 1]} : vector<9x8xf32> to vector<1x8xf32>
    %64 = vector.shape_cast %63 : vector<1x8xf32> to vector<8xf32>
    %65 = vector.shape_cast %64 : vector<8xf32> to vector<1x1x8xf32>
    %66 = vector.broadcast %65 : vector<1x1x8xf32> to vector<16x16x8xf32>
    %67 = arith.mulf %62, %66 : vector<16x16x8xf32>
    %68 = arith.addf %61, %67 : vector<16x16x8xf32>
    %c2_38 = arith.constant 2 : index
    %c2_39 = arith.constant 2 : index
    %c0_40 = arith.constant 0 : index
    %69 = vector.load %arg7[%c2_38, %c2_39, %c0_40] : memref<18x18x8xf32, #tpu.memory_space<vmem>>, vector<16x16x8xf32>
    %70 = vector.extract_strided_slice %13 {offsets = [8, 0], sizes = [1, 8], strides = [1, 1]} : vector<9x8xf32> to vector<1x8xf32>
    %71 = vector.shape_cast %70 : vector<1x8xf32> to vector<8xf32>
    %72 = vector.shape_cast %71 : vector<8xf32> to vector<1x1x8xf32>
    %73 = vector.broadcast %72 : vector<1x1x8xf32> to vector<16x16x8xf32>
    %74 = arith.mulf %69, %73 : vector<16x16x8xf32>
    %75 = arith.addf %68, %74 : vector<16x16x8xf32>
    %c0_41 = arith.constant 0 : index
    %c0_42 = arith.constant 0 : index
    %76 = vector.load %arg5[%c0_41, %c0_42] : memref<1x8xf32, #tpu.memory_space<vmem>>, vector<1x8xf32>
    %77 = vector.shape_cast %76 : vector<1x8xf32> to vector<1x1x8xf32>
    %78 = vector.broadcast %77 : vector<1x1x8xf32> to vector<16x16x8xf32>
    %79 = arith.addf %75, %78 : vector<16x16x8xf32>
    %cst_43 = arith.constant 0.000000e+00 : f32
    %80 = vector.broadcast %cst_43 : f32 to vector<16x16x8xf32>
    %81 = arith.maximumf %79, %80 : vector<16x16x8xf32>
    %82 = vector.extract_strided_slice %81 {offsets = [0, 0, 0], sizes = [16, 16, 7], strides = [1, 1, 1]} : vector<16x16x8xf32> to vector<16x16x7xf32>
    %c0_44 = arith.constant 0 : index
    %c0_45 = arith.constant 0 : index
    %c0_46 = arith.constant 0 : index
    %c0_47 = arith.constant 0 : index
    %83 = vector.load %arg6[%c0_44, %c0_45, %c0_46, %c0_47] : memref<1x16x16x7xf32, #tpu.memory_space<vmem>>, vector<1x16x16x7xf32>
    %84 = vector.shape_cast %83 : vector<1x16x16x7xf32> to vector<16x16x7xf32>
    %85 = vector.shape_cast %82 : vector<16x16x7xf32> to vector<1x16x16x7xf32>
    tpu.vector_store %arg6[%c0_44, %c0_45, %c0_46, %c0_47], %85 {strides = array<i32>} : memref<1x16x16x7xf32, #tpu.memory_space<vmem>>, vector<1x16x16x7xf32>,
    return
  }
  func.func @transform_0(%arg0: i32) -> (i32, i32, i32) {
    %c0_i32 = arith.constant 0 : i32
    %c0_i32_0 = arith.constant 0 : i32
    %c0_i32_1 = arith.constant 0 : i32
    return %arg0, %c0_i32, %c0_i32_0 : i32, i32, i32
  }
  func.func @transform_1(%arg0: i32) -> (i32, i32) {
    %c0_i32 = arith.constant 0 : i32
    %c0_i32_0 = arith.constant 0 : i32
    %c0_i32_1 = arith.constant 0 : i32
    return %c0_i32, %c0_i32_0 : i32, i32
  }
  func.func @transform_2(%arg0: i32) -> (i32, i32) {
    %c0_i32 = arith.constant 0 : i32
    %c0_i32_0 = arith.constant 0 : i32
    %c0_i32_1 = arith.constant 0 : i32
    return %c0_i32, %c0_i32_0 : i32, i32
  }
  func.func @transform_3(%arg0: i32) -> (i32, i32) {
    %c0_i32 = arith.constant 0 : i32
    %c0_i32_0 = arith.constant 0 : i32
    %c0_i32_1 = arith.constant 0 : i32
    return %c0_i32, %c0_i32_0 : i32, i32
  }
  func.func @transform_4(%arg0: i32) -> (i32, i32) {
    %c0_i32 = arith.constant 0 : i32
    %c0_i32_0 = arith.constant 0 : i32
    %c0_i32_1 = arith.constant 0 : i32
    return %c0_i32, %c0_i32_0 : i32, i32
  }
  func.func @transform_5(%arg0: i32) -> (i32, i32, i32, i32) {
    %c0_i32 = arith.constant 0 : i32
    %c0_i32_0 = arith.constant 0 : i32
    %c0_i32_1 = arith.constant 0 : i32
    %c0_i32_2 = arith.constant 0 : i32
    return %arg0, %c0_i32, %c0_i32_0, %c0_i32_1 : i32, i32, i32, i32
  }
}

</mosaic_0001>

<bundles_post_ra>
// kernel: tpu_custom_call.1
= control target key start
LH: loop header
LB: loop body
LE: loop exit
PB: predicated region body
PF: predicated region fallthrough
CT: control target
= control target key end

     0   :  { %s1772_s18 = smov 0   ;;  %s2879_s0 = inlined_call_operand.vmem [shape: bf16[2,256,4], index: 0, kind: input, shape index: {}]   ;;  %s2880_s1 = inlined_call_operand.vmem [shape: bf16[4,8], index: 1, kind: input, shape index: {}]   ;;  %s2881_s2 = inlined_call_operand.vmem [shape: f32[1,8], index: 2, kind: input, shape index: {}]   ;;  %s2882_s3 = inlined_call_operand.vmem [shape: f32[9,8], index: 3, kind: input, shape index: {}]   ;;  %s2883_s4 = inlined_call_operand.vmem [shape: f32[1,8], index: 4, kind: input, shape index: {}]   ;;  %s2884_s5 = inlined_call_operand.vmem [shape: f32[2,16,16,7], index: 5, kind: output, shape index: {}]  }
   0x1 LB: > { %s1606_s19 = sadd.s32 4294967295, %s1739_s18   ;;  %p1610_p0 = scmp.ge.s32.totalorder %s1739_s18, 1  ;;  %s1739_s18 = sphi %s1772_s18, %s15_s18  }
   0x2   : > { %p187_p1 = scmp.lt.s32.totalorder %s1739_s18, 3 }
   0x4   : > { %p188_p2 = pnand %p1610_p0, %p187_p1 }
   0x6   : > { %191 = sbr.rel (%p188_p2) target bundleno = 335 (0x14f), region = 40 }
   0xb   : > { %v258_v0 = vld [vmem:[%s2880_s1] sm:$0x3]  ;;  %vm392_vm0 = vcmask 1041408   ;;  %p215_p3 = scmp.lt.s32.totalorder %s1606_s19, 1  ;;  %vm343_vm1 = vcmask 31744   ;;  %vm517_vm2 = vcmask 64512  }
   0xc   : > { %v394_v1 = vsel %vm392_vm0, %v258_v0, 0  ;;  %v1741_v18 = vmov 0.0   ;;  %v1858_v19 = vld [vmem:[%s2881_s2] ss:$0 sm:$0xff]  ;;  %vm520_vm3 = vcmask 58368   ;;  %vm1518_vm4 = vcmask 56320  }
   0xd   : > { %403 = vmatpush.bf16.msra.mxu0 %v394_v1  ;;  %1715 = vmatpush.bf16.msra.mxu1 %v394_v1  ;;  %s2986_s19 = smov (!%p215_p3, %s1606_s19), 1  ;;  %518 = vst.msk [vmem:[#allocation2] sm:$0xff] %vm517_vm2, %v1741_v18  ;;  %v1907_v40 = vld [vmem:[%s2882_s3] sm:$0xff] }
   0xe   : > { %1716 = vmatpush.bf16.msra.mxu2 %v394_v1  ;;  %1717 = vmatpush.bf16.msra.mxu3 %v394_v1  ;;  %s1697_s22 = sshll.u32 %s2986_s19, 7  ;;  %519 = vst.msk [vmem:[#allocation2 + $0x8] sm:$0xff] %vm517_vm2, %v1741_v18  ;;  %v1916_v41 = vperm.slane %v1907_v40, 0  ;;  %v1921_v43 = vperm.slane %v1907_v40, 1  ;;  %v1938_v53 = vperm.slane %v1907_v40, 2  ;;  %v1950_v63 = vperm.slane %v1907_v40, 3 }
   0xf   : > { %s219_s25 = scalar_lea.vmem %s2879_s0, %s1697_s22  ;;  %522 = vst.msk [vmem:[#allocation2 + $0x18] sm:$0xff] %vm517_vm2, %v1741_v18  ;;  %s1698_s9 = sshll.u32 %s2986_s19, 8 }
  0x10   : > { %v1699_v2 = vld [vmem:[%s219_s25] sm:$0xff]  ;;  %v1700_v6 = vld [vmem:[%s219_s25 + $0x8] sm:$0xff]  ;;  %v1701_v10 = vld [vmem:[%s219_s25 + $0x10] sm:$0xff]  ;;  %523 = vst.msk [vmem:[#allocation2 + $0x20] sm:$0xff] %vm517_vm2, %v1741_v18  ;;  %s2194_s12 = scalar_lea.vmem %s2884_s5, %s1698_s9 }
  0x11   : > { %v1703_v3 = vld [vmem:[%s219_s25 + $0x20] sm:$0xff]  ;;  %1679 = vmatmul.msk.bf16.vlgmr.msra.gmra.mxu0 %vm343_vm1, %v1699_v2  ;;  %v1704_v7 = vld [vmem:[%s219_s25 + $0x28] sm:$0xff]  ;;  %v1705_v11 = vld [vmem:[%s219_s25 + $0x30] sm:$0xff]  ;;  %525 = vst.msk [vmem:[#allocation2 + $0x30] sm:$0xff] %vm517_vm2, %v1741_v18 }
  0x12   : > { %v1707_v4 = vld [vmem:[%s219_s25 + $0x40] sm:$0xff]  ;;  %1683 = vmatmul.msk.bf16.vlgmr.msra.gmra.mxu1 %vm343_vm1, %v1703_v3  ;;  %v1708_v8 = vld [vmem:[%s219_s25 + $0x48] sm:$0xff]  ;;  %v1709_v12 = vld [vmem:[%s219_s25 + $0x50] sm:$0xff]  ;;  %526 = vst.msk [vmem:[#allocation2 + $0x38] sm:$0xff] %vm517_vm2, %v1741_v18 }
  0x13   : > { %v1711_v5 = vld [vmem:[%s219_s25 + $0x60] sm:$0xff]  ;;  %1687 = vmatmul.msk.bf16.vlgmr.msra.gmra.mxu2 %vm343_vm1, %v1707_v4  ;;  %v1712_v9 = vld [vmem:[%s219_s25 + $0x68] sm:$0xff]  ;;  %v1713_v13 = vld [vmem:[%s219_s25 + $0x70] sm:$0xff]  ;;  %528 = vst.msk [vmem:[#allocation2 + $0x48] sm:$0xff] %vm517_vm2, %v1741_v18 }
  0x14   : > { %1691 = vmatmul.msk.bf16.vlgmr.msra.gmra.mxu3 %vm343_vm1, %v1711_v5  ;;  %v1702_v14 = vld [vmem:[%s219_s25 + $0x18] sm:$0xff]  ;;  %529 = vst.msk [vmem:[#allocation2 + $0x50] sm:$0xff] %vm517_vm2, %v1741_v18  ;;  %v608_v42 = vld [vmem:[#allocation2] sm:$0xff] }
  0x15   : > { %v1706_v15 = vld [vmem:[%s219_s25 + $0x38] sm:$0xff]  ;;  %531 = vst.msk [vmem:[#allocation2 + $0x60] sm:$0xff] %vm517_vm2, %v1741_v18  ;;  %v673_v47 = vld [vmem:[#allocation2 + $0x1] sm:$0xff]  ;;  %v641_v50 = vmul.f32 %v1916_v41, %v608_v42 }
  0x16   : > { %v1710_v16 = vld [vmem:[%s219_s25 + $0x58] sm:$0xff]  ;;  %532 = vst.msk [vmem:[#allocation2 + $0x68] sm:$0xff] %vm517_vm2, %v1741_v18  ;;  %v706_v52 = vmul.f32 %v1921_v43, %v673_v47  ;;  %v770_v57 = vld [vmem:[#allocation2 + $0x2] sm:$0xff] }
  0x17   : > { %v1714_v17 = vld [vmem:[%s219_s25 + $0x78] sm:$0xff]  ;;  %534 = vst.msk [vmem:[#allocation2 + $0x78] sm:$0xff] %vm517_vm2, %v1741_v18  ;;  %v609_v0 = vld [vmem:[#allocation2 + $0x8] sm:$0xff]  ;;  %v803_v5 = vmul.f32 %v1938_v53, %v770_v57 }
  0x18   : > { %535 = vst.msk [vmem:[#allocation2 + $0x80] sm:$0xff] %vm517_vm2, %v1741_v18  ;;  %v738_v4 = vadd.f32 %v706_v52, %v641_v50 }
  0x19   : > { %537 = vst.msk [vmem:[#allocation2 + $0x90] sm:$0xff] %vm517_vm2, %v1741_v18 }
  0x1a   : > { %538 = vst.msk [vmem:[#allocation2 + $0x98] sm:$0xff] %vm517_vm2, %v1741_v18 }
  0x1b   : > { %540 = vst.msk [vmem:[#allocation2 + $0xa8] sm:$0xff] %vm517_vm2, %v1741_v18 }
  0x1c   : > { %541 = vst.msk [vmem:[#allocation2 + $0xb0] sm:$0xff] %vm517_vm2, %v1741_v18 }
  0x1d   : > { %543 = vst.msk [vmem:[#allocation2 + $0xc0] sm:$0xff] %vm517_vm2, %v1741_v18 }
  0x1e   : > { %544 = vst.msk [vmem:[#allocation2 + $0xc8] sm:$0xff] %vm517_vm2, %v1741_v18 }
  0x1f   : > { %546 = vst.msk [vmem:[#allocation2 + $0xd8] sm:$0xff] %vm517_vm2, %v1741_v18 }
  0x20   : > { %547 = vst.msk [vmem:[#allocation2 + $0xe0] sm:$0xff] %vm517_vm2, %v1741_v18 }
  0x21   : > { %1680 = vmatmul.msk.bf16.gmra.mxu0 %vm343_vm1, %v1700_v6  ;;  %549 = vst.msk [vmem:[#allocation2 + $0xf0] sm:$0xff] %vm517_vm2, %v1741_v18 }
  0x22   : > { %1684 = vmatmul.msk.bf16.gmra.mxu1 %vm343_vm1, %v1704_v7  ;;  %550 = vst.msk [vmem:[#allocation2 + $0xf8] sm:$0xff] %vm517_vm2, %v1741_v18 }
  0x23   : > { %1688 = vmatmul.msk.bf16.gmra.mxu2 %vm343_vm1, %v1708_v8  ;;  %552 = vst.msk [vmem:[#allocation2 + $0x108] sm:$0xff] %vm517_vm2, %v1741_v18 }
  0x24   : > { %1692 = vmatmul.msk.bf16.gmra.mxu3 %vm343_vm1, %v1712_v9  ;;  %553 = vst.msk [vmem:[#allocation2 + $0x110] sm:$0xff] %vm517_vm2, %v1741_v18 }
  0x25   : > { %555 = vst.msk [vmem:[#allocation2 + $0x120] sm:$0xff] %vm517_vm2, %v1741_v18 }
  0x26   : > { %556 = vst.msk [vmem:[#allocation2 + $0x128] sm:$0xff] %vm517_vm2, %v1741_v18 }
  0x27   : > { %558 = vst.msk [vmem:[#allocation2 + $0x138] sm:$0xff] %vm517_vm2, %v1741_v18 }
  0x28   : > { %559 = vst.msk [vmem:[#allocation2 + $0x140] sm:$0xff] %vm517_vm2, %v1741_v18 }
  0x29   : > { %561 = vst.msk [vmem:[#allocation2 + $0x150] sm:$0xff] %vm517_vm2, %v1741_v18 }
  0x2a   : > { %562 = vst.msk [vmem:[#allocation2 + $0x158] sm:$0xff] %vm517_vm2, %v1741_v18 }
  0x2b   : > { %564 = vst.msk [vmem:[#allocation2 + $0x168] sm:$0xff] %vm517_vm2, %v1741_v18 }
  0x2c   : > { %565 = vst.msk [vmem:[#allocation2 + $0x170] sm:$0xff] %vm517_vm2, %v1741_v18 }
  0x2d   : > { %567 = vst.msk [vmem:[#allocation2 + $0x180] sm:$0xff] %vm517_vm2, %v1741_v18 }
  0x2e   : > { %568 = vst.msk [vmem:[#allocation2 + $0x188] sm:$0xff] %vm517_vm2, %v1741_v18 }
  0x2f   : > { %570 = vst.msk [vmem:[#allocation2 + $0x198] sm:$0xff] %vm517_vm2, %v1741_v18 }
  0x30   : > { %571 = vst.msk [vmem:[#allocation2 + $0x1a0] sm:$0xff] %vm517_vm2, %v1741_v18 }
  0x31   : > { %1681 = vmatmul.msk.bf16.gmra.mxu0 %vm343_vm1, %v1701_v10  ;;  %521 = vst.msk [vmem:[#allocation2 + $0x10] sm:$0x3] %vm520_vm3, %v1741_v18 }
  0x32   : > { %1685 = vmatmul.msk.bf16.gmra.mxu1 %vm343_vm1, %v1705_v11  ;;  %524 = vst.msk [vmem:[#allocation2 + $0x28] sm:$0x3] %vm520_vm3, %v1741_v18 }
  0x33   : > { %1689 = vmatmul.msk.bf16.gmra.mxu2 %vm343_vm1, %v1709_v12  ;;  %527 = vst.msk [vmem:[#allocation2 + $0x40] sm:$0x3] %vm520_vm3, %v1741_v18 }
  0x34   : > { %1693 = vmatmul.msk.bf16.gmra.mxu3 %vm343_vm1, %v1713_v13  ;;  %530 = vst.msk [vmem:[#allocation2 + $0x58] sm:$0x3] %vm520_vm3, %v1741_v18  ;;  %v642_v13 = vmul.f32 %v1916_v41, %v609_v0 }
  0x35   : > { %533 = vst.msk [vmem:[#allocation2 + $0x70] sm:$0x3] %vm520_vm3, %v1741_v18 }
  0x36   : > { %536 = vst.msk [vmem:[#allocation2 + $0x88] sm:$0x3] %vm520_vm3, %v1741_v18 }
  0x37   : > { %539 = vst.msk [vmem:[#allocation2 + $0xa0] sm:$0x3] %vm520_vm3, %v1741_v18 }
  0x38   : > { %542 = vst.msk [vmem:[#allocation2 + $0xb8] sm:$0x3] %vm520_vm3, %v1741_v18  ;;  %v674_v1 = vld [vmem:[#allocation2 + $0x9] sm:$0xff] }
  0x39   : > { %545 = vst.msk [vmem:[#allocation2 + $0xd0] sm:$0x3] %vm520_vm3, %v1741_v18 }
  0x3a   : > { %548 = vst.msk [vmem:[#allocation2 + $0xe8] sm:$0x3] %vm520_vm3, %v1741_v18 }
  0x3b   : > { %551 = vst.msk [vmem:[#allocation2 + $0x100] sm:$0x3] %vm520_vm3, %v1741_v18 }
  0x3c   : > { %554 = vst.msk [vmem:[#allocation2 + $0x118] sm:$0x3] %vm520_vm3, %v1741_v18 }
  0x3d   : > { %557 = vst.msk [vmem:[#allocation2 + $0x130] sm:$0x3] %vm520_vm3, %v1741_v18 }
  0x3e   : > { %560 = vst.msk [vmem:[#allocation2 + $0x148] sm:$0x3] %vm520_vm3, %v1741_v18 }
  0x3f   : > { %563 = vst.msk [vmem:[#allocation2 + $0x160] sm:$0x3] %vm520_vm3, %v1741_v18 }
  0x40   : > { %566 = vst.msk [vmem:[#allocation2 + $0x178] sm:$0x3] %vm520_vm3, %v1741_v18 }
  0x41   : > { %1682 = vmatmul.msk.bf16.gmra.mxu0 %vm343_vm1, %v1702_v14  ;;  %569 = vst.msk [vmem:[#allocation2 + $0x190] sm:$0x3] %vm520_vm3, %v1741_v18  ;;  %v707_v14 = vmul.f32 %v1921_v43, %v674_v1 }
  0x42   : > { %1686 = vmatmul.msk.bf16.gmra.mxu1 %vm343_vm1, %v1706_v15  ;;  %572 = vst.msk [vmem:[#allocation2 + $0x1a8] sm:$0x3] %vm520_vm3, %v1741_v18 }
  0x43   : > { %1690 = vmatmul.msk.bf16.gmra.mxu2 %vm343_vm1, %v1710_v16 }
  0x44   : > { %1694 = vmatmul.msk.bf16.gmra.mxu3 %vm343_vm1, %v1714_v17  ;;  %v771_v17 = vld [vmem:[#allocation2 + $0xa] sm:$0xff] }
  0x8e   : > { %v405_v20 = vpop.f32.mrf.mxu0 }
  0x8f   : > { %v425_v21 = vpop.f32.mrf.mxu1  ;;  %v406_v22 = vadd.f32 %v1858_v19, %v405_v20  ;;  %v835_v20 = vadd.f32 %v803_v5, %v738_v4 }
  0x90   : > { %v426_v23 = vadd.f32 %v1858_v19, %v425_v21 }
  0x91   : > { %v485_v24 = vmax.f32 %v406_v22, 0.0  ;;  %v1967_v22 = vperm.slane %v1907_v40, 4 }
  0x92   : > { %v493_v25 = vmax.f32 %v426_v23, 0.0 }
  0x93   : > { %574 = vst.msk [vmem:[#allocation2 + $0x19] sm:$0xff] %vm517_vm2, %v485_v24 }
  0x94   : > { %582 = vst.msk [vmem:[#allocation2 + $0x79] sm:$0xff] %vm517_vm2, %v493_v25 }
  0x96   : > { %v445_v26 = vpop.f32.mrf.mxu2  ;;  %v407_v30 = vpop.f32.mrf.mxu0 }
  0x97   : > { %v465_v27 = vpop.f32.mrf.mxu3  ;;  %v446_v28 = vadd.f32 %v1858_v19, %v445_v26  ;;  %v427_v31 = vpop.f32.mrf.mxu1  ;;  %v408_v32 = vadd.f32 %v1858_v19, %v407_v30  ;;  %v739_v26 = vadd.f32 %v707_v14, %v642_v13 }
  0x98   : > { %v466_v29 = vadd.f32 %v1858_v19, %v465_v27  ;;  %v428_v44 = vadd.f32 %v1858_v19, %v427_v31  ;;  %v804_v27 = vmul.f32 %v1938_v53, %v771_v17 }
  0x99   : > { %v501_v33 = vmax.f32 %v446_v28, 0.0  ;;  %v486_v35 = vmax.f32 %v408_v32, 0.0 }
  0x9a   : > { %v509_v34 = vmax.f32 %v466_v29, 0.0  ;;  %v494_v54 = vmax.f32 %v428_v44, 0.0  ;;  %v610_v10 = vld [vmem:[#allocation2 + $0x18] sm:$0xff] }
  0x9b   : > { %590 = vst.msk [vmem:[#allocation2 + $0xd9] sm:$0xff] %vm517_vm2, %v501_v33  ;;  %v900_v21 = vmul.f32 %v1950_v63, %v610_v10  ;;  %v675_v24 = vld [vmem:[#allocation2 + $0x19] sm:$0xff]  ;;  %v643_v32 = vmul.f32 %v1916_v41, %v610_v10 }
  0x9c   : > { %598 = vst.msk [vmem:[#allocation2 + $0x139] sm:$0xff] %vm517_vm2, %v509_v34  ;;  %v618_v29 = vld [vmem:[#allocation2 + $0x78] sm:$0xff]  ;;  %v708_v33 = vmul.f32 %v1921_v43, %v675_v24 }
  0x9d   : > { %575 = vst.msk [vmem:[#allocation2 + $0x21] sm:$0xff] %vm517_vm2, %v486_v35  ;;  %v683_v30 = vld [vmem:[#allocation2 + $0x79] sm:$0xff]  ;;  %v932_v34 = vadd.f32 %v900_v21, %v835_v20  ;;  %v997_v35 = vmul.f32 %v1967_v22, %v675_v24  ;;  %v651_v42 = vmul.f32 %v1916_v41, %v618_v29 }
  0x9e   : > { %v447_v36 = vpop.f32.mrf.mxu2  ;;  %v410_v38 = vpop.f32.mrf.mxu0  ;;  %583 = vst.msk [vmem:[#allocation2 + $0x81] sm:$0xff] %vm517_vm2, %v494_v54  ;;  %v716_v44 = vmul.f32 %v1921_v43, %v683_v30  ;;  %v1995_v54 = vmul.f32 %v1950_v63, %v618_v29 }
  0x9f   : > { %v467_v37 = vpop.f32.mrf.mxu3  ;;  %v430_v39 = vpop.f32.mrf.mxu1  ;;  %v448_v48 = vadd.f32 %v1858_v19, %v447_v36  ;;  %v411_v51 = vadd.f32 %v1858_v19, %v410_v38  ;;  %v1979_v36 = vperm.slane %v1907_v40, 6  ;;  %v1029_v50 = vadd.f32 %v997_v35, %v932_v34 }
  0xa0   : > { %v468_v49 = vadd.f32 %v1858_v19, %v467_v37  ;;  %v431_v55 = vadd.f32 %v1858_v19, %v430_v39  ;;  %v1982_v37 = vperm.slane %v1907_v40, 7 }
  0xa1   : > { %v502_v58 = vmax.f32 %v448_v48, 0.0  ;;  %v487_v2 = vmax.f32 %v411_v51, 0.0  ;;  %v1990_v48 = vperm.slane %v1907_v40, 5  ;;  %v748_v40 = vadd.f32 %v716_v44, %v651_v42 }
  0xa2   : > { %v510_v61 = vmax.f32 %v468_v49, 0.0  ;;  %v495_v6 = vmax.f32 %v431_v55, 0.0  ;;  %v626_v38 = vld [vmem:[#allocation2 + $0xd8] sm:$0xff]  ;;  %v740_v49 = vadd.f32 %v708_v33, %v643_v32  ;;  %v1998_v55 = vmul.f32 %v1967_v22, %v683_v30 }
  0xa3   : > { %591 = vst.msk [vmem:[#allocation2 + $0xe1] sm:$0xff] %vm517_vm2, %v502_v58  ;;  %v691_v39 = vld [vmem:[#allocation2 + $0xd9] sm:$0xff]  ;;  %v659_v51 = vmul.f32 %v1916_v41, %v626_v38  ;;  %v2009_v1 = vmul.f32 %v1950_v63, %v626_v38 }
  0xa4   : > { %599 = vst.msk [vmem:[#allocation2 + $0x141] sm:$0xff] %vm517_vm2, %v510_v61  ;;  %v611_v31 = vld [vmem:[#allocation2 + $0x20] sm:$0xff]  ;;  %v724_v52 = vmul.f32 %v1921_v43, %v691_v39  ;;  %v2006_v61 = vmul.f32 %v1982_v37, %v683_v30  ;;  %v2018_v4 = vmul.f32 %v1982_v37, %v691_v39 }
  0xa5   : > { %576 = vst.msk [vmem:[#allocation2 + $0x31] sm:$0xff] %vm517_vm2, %v487_v2  ;;  %v901_v47 = vmul.f32 %v1950_v63, %v611_v31  ;;  %v699_v57 = vld [vmem:[#allocation2 + $0x139] sm:$0xff]  ;;  %v644_v58 = vmul.f32 %v1916_v41, %v611_v31  ;;  %v2012_v2 = vmul.f32 %v1967_v22, %v691_v39  ;;  %v773_v10 = vld [vmem:[#allocation2 + $0x22] sm:$0xff] }
  0xa6   : > { %v450_v45 = vpop.f32.mrf.mxu2  ;;  %v412_v56 = vpop.f32.mrf.mxu0  ;;  %584 = vst.msk [vmem:[#allocation2 + $0x91] sm:$0xff] %vm517_vm2, %v495_v6  ;;  %v619_v5 = vld [vmem:[#allocation2 + $0x80] sm:$0xff]  ;;  %v2031_v17 = vmul.f32 %v1967_v22, %v699_v57  ;;  %v2050_v32 = vmul.f32 %v1982_v37, %v699_v57  ;;  %v1095_v33 = vmul.f32 %v1990_v48, %v773_v10 }
  0xa7   : > { %v470_v46 = vpop.f32.mrf.mxu3  ;;  %v451_v59 = vadd.f32 %v1858_v19, %v450_v45  ;;  %v432_v60 = vpop.f32.mrf.mxu1  ;;  %v413_v3 = vadd.f32 %v1858_v19, %v412_v56  ;;  %v676_v45 = vld [vmem:[#allocation2 + $0x21] sm:$0xff]  ;;  %v634_v56 = vld [vmem:[#allocation2 + $0x138] sm:$0xff]  ;;  %2887 = vst [vmem:[#allocation3_spill] sm:$0xff] %v2009_v1  ;;  %v652_v20 = vmul.f32 %v1916_v41, %v619_v5 }
  0xa8   : > { %v471_v62 = vadd.f32 %v1858_v19, %v470_v46  ;;  %v433_v7 = vadd.f32 %v1858_v19, %v432_v60  ;;  %v836_v46 = vadd.f32 %v804_v27, %v739_v26  ;;  %v2003_v60 = vmul.f32 %v1979_v36, %v618_v29  ;;  %2888 = vst [vmem:[#allocation4_spill] sm:$0xff] %v2012_v2  ;;  %v684_v6 = vld [vmem:[#allocation2 + $0x81] sm:$0xff] }
  0xa9   : > { %v503_v11 = vmax.f32 %v451_v59, 0.0  ;;  %v488_v18 = vmax.f32 %v413_v3, 0.0  ;;  %v709_v59 = vmul.f32 %v1921_v43, %v676_v45  ;;  %v2015_v3 = vmul.f32 %v1979_v36, %v626_v38  ;;  %2890 = vst [vmem:[#allocation6_spill] sm:$0xff] %v2018_v4  ;;  %v781_v34 = vld [vmem:[#allocation2 + $0x82] sm:$0xff] }
  0xaa   : > { %v511_v15 = vmax.f32 %v471_v62, 0.0  ;;  %v496_v23 = vmax.f32 %v433_v7, 0.0  ;;  %v772_v62 = vld [vmem:[#allocation2 + $0x1a] sm:$0xff]  ;;  %v933_v0 = vadd.f32 %v901_v47, %v836_v46  ;;  %v2020_v7 = vadd.f32 %v724_v52, %v659_v51  ;;  %2892 = vst [vmem:[#allocation8_spill] sm:$0xff] %v2031_v17 }
  0xab   : > { %592 = vst.msk [vmem:[#allocation2 + $0xf1] sm:$0xff] %vm517_vm2, %v503_v11  ;;  %v998_v11 = vmul.f32 %v1967_v22, %v676_v45  ;;  %v741_v13 = vadd.f32 %v709_v59, %v644_v58  ;;  %v805_v14 = vmul.f32 %v1938_v53, %v772_v62  ;;  %v717_v21 = vmul.f32 %v1921_v43, %v684_v6  ;;  %v627_v27 = vld [vmem:[#allocation2 + $0xe0] sm:$0xff]  ;;  %v2061_v45 = vld [vmem:[%s2882_s3 + $0x8] ss:$0 sm:$0xff] }
  0xac   : > { %600 = vst.msk [vmem:[#allocation2 + $0x151] sm:$0xff] %vm517_vm2, %v511_v15  ;;  %v1094_v15 = vmul.f32 %v1990_v48, %v772_v62  ;;  %v2037_v24 = vld [vmem:[#allocation2 + $0x31] sm:$0xff]  ;;  %v806_v26 = vmul.f32 %v1938_v53, %v773_v10  ;;  %v660_v52 = vmul.f32 %v1916_v41, %v627_v27  ;;  %v814_v58 = vmul.f32 %v1938_v53, %v781_v34  ;;  %v789_v59 = vld [vmem:[#allocation2 + $0xe2] sm:$0xff] }
  0xad   : > { %577 = vst.msk [vmem:[#allocation2 + $0x39] sm:$0xff] %vm517_vm2, %v488_v18  ;;  %v1030_v18 = vadd.f32 %v998_v11, %v933_v0  ;;  %v710_v30 = vmul.f32 %v1921_v43, %v2037_v24  ;;  %v2054_v39 = vadd.f32 %v805_v14, %v740_v49  ;;  %v749_v51 = vadd.f32 %v717_v21, %v652_v20 }
  0xae   : > { %v452_v8 = vpop.f32.mrf.mxu2  ;;  %585 = vst.msk [vmem:[#allocation2 + $0x99] sm:$0xff] %vm517_vm2, %v496_v23  ;;  %v2035_v23 = vld [vmem:[#allocation2 + $0x30] sm:$0xff]  ;;  %v415_v38 = vpop.f32.mrf.mxu0  ;;  %v2056_v42 = vadd.f32 %v806_v26, %v741_v13  ;;  %v1126_v44 = vadd.f32 %v1094_v15, %v1029_v50  ;;  %v2067_v49 = vmul.f32 %v1950_v63, %v619_v5  ;;  %v2070_v50 = vmul.f32 %v1967_v22, %v684_v6 }
  0xaf   : > { %v472_v9 = vpop.f32.mrf.mxu3  ;;  %v453_v12 = vadd.f32 %v1858_v19, %v452_v8  ;;  %2889 = vst [vmem:[#allocation5_spill] sm:$0xff] %v2015_v3  ;;  %v667_v8 = vmul.f32 %v1916_v41, %v634_v56  ;;  %v645_v29 = vmul.f32 %v1916_v41, %v2035_v23  ;;  %v1127_v47 = vadd.f32 %v1095_v33, %v1030_v18  ;;  %v797_v3 = vld [vmem:[#allocation2 + $0x142] sm:$0xff] }
  0xb0   : > { %v473_v16 = vadd.f32 %v1858_v19, %v472_v9  ;;  %v732_v9 = vmul.f32 %v1921_v43, %v699_v57  ;;  %2894 = vst [vmem:[#allocation10_spill] sm:$0xff] %v2050_v32  ;;  %v788_v57 = vld [vmem:[#allocation2 + $0xda] sm:$0xff]  ;;  %v2073_v62 = vadd.f32 %v1858_v19, %v415_v38  ;;  %v1192_v10 = vmul.f32 %v1979_v36, %v2035_v23 }
  0xb1   : > { %v504_v25 = vmax.f32 %v453_v12, 0.0  ;;  %v2026_v12 = vmul.f32 %v1950_v63, %v634_v56  ;;  %v742_v46 = vadd.f32 %v710_v30, %v645_v29  ;;  %v2088_v13 = vmul.f32 %v1979_v36, %v619_v5  ;;  %v635_v38 = vld [vmem:[#allocation2 + $0x140] sm:$0xff] }
  0xb2   : > { %v512_v28 = vmax.f32 %v473_v16, 0.0  ;;  %v780_v16 = vld [vmem:[#allocation2 + $0x7a] sm:$0xff]  ;;  %v2047_v31 = vadd.f32 %v732_v9, %v667_v8  ;;  %v2081_v9 = vmul.f32 %v1990_v48, %v781_v34  ;;  %v2091_v14 = vmul.f32 %v1982_v37, %v684_v6 }
  0xb3   : > { %593 = vst.msk [vmem:[#allocation2 + $0xf9] sm:$0xff] %vm517_vm2, %v504_v25  ;;  %v2040_v25 = vmul.f32 %v1979_v36, %v634_v56  ;;  %v813_v35 = vmul.f32 %v1938_v53, %v780_v16  ;;  %v2078_v8 = vmul.f32 %v1990_v48, %v780_v16  ;;  %v821_v15 = vmul.f32 %v1938_v53, %v788_v57 }
  0xb4   : > { %601 = vst.msk [vmem:[#allocation2 + $0x159] sm:$0xff] %vm517_vm2, %v512_v28  ;;  %v692_v28 = vld [vmem:[#allocation2 + $0xe1] sm:$0xff]  ;;  %v2085_v11 = vld [vmem:[#allocation2 + $0x38] sm:$0xff]  ;;  %v2099_v20 = vadd.f32 %v814_v58, %v749_v51  ;;  %v2102_v21 = vmul.f32 %v2061_v45, %v781_v34  ;;  %v822_v29 = vmul.f32 %v1938_v53, %v789_v59  ;;  %v2108_v6 = vmul.f32 %v1950_v63, %v627_v27 }
  0xb5   : > { %2891 = vst [vmem:[#allocation7_spill] sm:$0xff] %v2026_v12  ;;  %v725_v56 = vmul.f32 %v1921_v43, %v692_v28  ;;  %v2075_v0 = vadd.f32 %v813_v35, %v748_v40  ;;  %v2094_v40 = vmul.f32 %v2061_v45, %v780_v16  ;;  %v2097_v18 = vld [vmem:[#allocation2 + $0x39] sm:$0xff]  ;;  %v2111_v16 = vmul.f32 %v1967_v22, %v692_v28  ;;  %v700_v51 = vld [vmem:[#allocation2 + $0x141] sm:$0xff] }
  0xb6   : > { %2893 = vst [vmem:[#allocation9_spill] sm:$0xff] %v2040_v25  ;;  %v2105_v5 = vld [vmem:[#allocation2 + $0x32] sm:$0xff]  ;;  %v2114_v30 = vmul.f32 %v1990_v48, %v788_v57  ;;  %v646_v33 = vmul.f32 %v1916_v41, %v2085_v11  ;;  %v2118_v35 = vld [vmem:[#allocation2 + $0x3a] sm:$0xff]  ;;  %v2121_v34 = vmul.f32 %v1990_v48, %v789_v59  ;;  %v711_v58 = vmul.f32 %v1921_v43, %v2097_v18 }
  0xb7   : > { %2895 = vst [vmem:[#allocation11_spill] sm:$0xff] %v2081_v9  ;;  %v757_v26 = vadd.f32 %v725_v56, %v660_v52  ;;  %v1224_v52 = vadd.f32 %v1192_v10, %v1126_v44  ;;  %v1289_v56 = vmul.f32 %v1982_v37, %v2037_v24  ;;  %v2128_v32 = vadd.f32 %v821_v15, %v2020_v7  ;;  %v796_v12 = vld [vmem:[#allocation2 + $0x13a] sm:$0xff] }
  0xb8   : > { %2896 = vst [vmem:[#allocation12_spill] sm:$0xff] %v2088_v13  ;;  %v2131_v25 = vmul.f32 %v1979_v36, %v627_v27  ;;  %v2134_v17 = vmul.f32 %v1982_v37, %v692_v28  ;;  %v807_v4 = vmul.f32 %v1938_v53, %v2105_v5  ;;  %v2141_v10 = vmul.f32 %v2061_v45, %v788_v57 }
  0xb9   : > { %2897 = vst [vmem:[#allocation13_spill] sm:$0xff] %v2091_v14  ;;  %v2138_v44 = vadd.f32 %v822_v29, %v757_v26  ;;  %v808_v7 = vmul.f32 %v1938_v53, %v2118_v35  ;;  %v668_v27 = vmul.f32 %v1916_v41, %v635_v38  ;;  %v733_v28 = vmul.f32 %v1921_v43, %v700_v51 }
  0xba   : > { %2898 = vst [vmem:[#allocation14_spill] sm:$0xff] %v2094_v40  ;;  %v2147_v15 = vadd.f32 %v807_v4, %v742_v46  ;;  %v829_v26 = vmul.f32 %v1938_v53, %v796_v12  ;;  %v1321_v29 = vadd.f32 %v1289_v56, %v1224_v52  ;;  %v2164_v4 = vmul.f32 %v2061_v45, %v789_v59 }
  0xbb   : > { %2899 = vst [vmem:[#allocation15_spill] sm:$0xff] %v2102_v21  ;;  %v830_v46 = vmul.f32 %v1938_v53, %v797_v3  ;;  %v2171_v52 = vmul.f32 %v1950_v63, %v635_v38  ;;  %v2174_v56 = vmul.f32 %v1967_v22, %v700_v51  ;;  %v765_v59 = vadd.f32 %v733_v28, %v668_v27 }
  0xbc   : > { %2900 = vst [vmem:[#allocation16_spill] sm:$0xff] %v2108_v6  ;;  %v1387_v2 = vmul.f32 %v2061_v45, %v2118_v35  ;;  %v861_v6 = vadd.f32 %v829_v26, %v2047_v31  ;;  %v2200_v27 = vmul.f32 %v2061_v45, %v796_v12  ;;  %v685_v31 = vld [vmem:[#allocation2 + $0x91] sm:$0xff] }
  0xbd   : > { %2901 = vst [vmem:[#allocation17_spill] sm:$0xff] %v2111_v16  ;;  %v2228_v21 = vmul.f32 %v1982_v37, %v685_v31 }
  0xbe   : > { %2902 = vst [vmem:[#allocation18_spill] sm:$0xff] %v2114_v30  ;;  %v620_v30 = vld [vmem:[#allocation2 + $0x90] sm:$0xff] }
  0xbf   : > { %2903 = vst [vmem:[#allocation19_spill] sm:$0xff] %v2121_v34  ;;  %v743_v34 = vadd.f32 %v711_v58, %v646_v33  ;;  %v1386_v33 = vmul.f32 %v2061_v45, %v2105_v5  ;;  %v2159_v58 = vld [vmem:[%s2883_s4] ss:$0 sm:$0xff]  ;;  %v910_v28 = vmul.f32 %v1950_v63, %v620_v30  ;;  %v2225_v1 = vmul.f32 %v1979_v36, %v620_v30 }
  0xc0   : > { %2904 = vst [vmem:[#allocation20_spill] sm:$0xff] %v2131_v25 }
  0xc1   : > { %2905 = vst [vmem:[#allocation21_spill] sm:$0xff] %v2134_v17  ;;  %v1193_v17 = vmul.f32 %v1979_v36, %v2085_v11  ;;  %v2152_v57 = vadd.f32 %v808_v7, %v743_v34  ;;  %v1290_v34 = vmul.f32 %v1982_v37, %v2097_v18  ;;  %v902_v7 = vmul.f32 %v1950_v63, %v2035_v23  ;;  %v636_v23 = vld [vmem:[#allocation2 + $0x150] sm:$0xff] }
  0xc2   : > { %2906 = vst [vmem:[#allocation22_spill] sm:$0xff] %v2141_v10  ;;  %v2161_v10 = vpop.f32.mrf.mxu1  ;;  %v1418_v16 = vadd.f32 %v1386_v33, %v1321_v29  ;;  %v693_v33 = vld [vmem:[#allocation2 + $0xf1] sm:$0xff] }
  0xc3   : > { %2907 = vst [vmem:[#allocation23_spill] sm:$0xff] %v2159_v58  ;;  %v1225_v25 = vadd.f32 %v1193_v17, %v1127_v47  ;;  %v628_v17 = vld [vmem:[#allocation2 + $0xf0] sm:$0xff] }
  0xc4   : > { %2908 = vst [vmem:[#allocation24_spill] sm:$0xff] %v2164_v4  ;;  %v2179_v4 = vmul.f32 %v1990_v48, %v796_v12  ;;  %v1454_v29 = vadd.f32 %v2159_v58, %v1418_v16  ;;  %v999_v16 = vmul.f32 %v1967_v22, %v2037_v24  ;;  %v2210_v12 = vmul.f32 %v2061_v45, %v797_v3 }
  0xc5   : > { %2909 = vst [vmem:[#allocation25_spill] sm:$0xff] %v2171_v52  ;;  %v1322_v47 = vadd.f32 %v1290_v34, %v1225_v25  ;;  %v2185_v52 = vmul.f32 %v1990_v48, %v797_v3  ;;  %v2197_v25 = vmul.f32 %v1982_v37, %v700_v51  ;;  %v918_v34 = vmul.f32 %v1950_v63, %v628_v17  ;;  %v475_v51 = vpop.f32.mrf.mxu3 }
  0xc6   : > { %2910 = vst [vmem:[#allocation26_spill] sm:$0xff] %v2174_v56  ;;  %v2188_v56 = vmul.f32 %v1979_v36, %v635_v38  ;;  %v934_v38 = vadd.f32 %v902_v7, %v2054_v39  ;;  %v653_v39 = vmul.f32 %v1916_v41, %v620_v30  ;;  %v718_v7 = vmul.f32 %v1921_v43, %v685_v31 }
  0xc7   : > { %2911 = vst [vmem:[#allocation27_spill] sm:$0xff] %v2179_v4  ;;  %v1419_v26 = vadd.f32 %v1387_v2, %v1322_v47  ;;  %v1007_v24 = vmul.f32 %v1967_v22, %v685_v31  ;;  %v701_v47 = vld [vmem:[#allocation2 + $0x151] sm:$0xff]  ;;  %v942_v3 = vadd.f32 %v910_v28, %v2075_v0  ;;  %v1096_v31 = vmul.f32 %v1990_v48, %v2105_v5 }
  0xc8   : > { %2912 = vst [vmem:[#allocation28_spill] sm:$0xff] %v2185_v52  ;;  %v455_v52 = vpop.f32.mrf.mxu2  ;;  %v1031_v4 = vadd.f32 %v999_v16, %v934_v38  ;;  %v734_v0 = vmul.f32 %v1921_v43, %v701_v47  ;;  %v1023_v40 = vmul.f32 %v1967_v22, %v701_v47  ;;  %v1015_v38 = vmul.f32 %v1967_v22, %v693_v33  ;;  %v2240_v16 = vld [vmem:[#allocation2 + $0x98] sm:$0xff] }
  0xc9   : > { %2913 = vst [vmem:[#allocation29_spill] sm:$0xff] %v2188_v56  ;;  %v1486_v56 = vmax.f32 %v1454_v29, 0.0  ;;  %v1455_v2 = vadd.f32 %v2159_v58, %v1419_v26  ;;  %v903_v29 = vmul.f32 %v1950_v63, %v2085_v11  ;;  %v950_v11 = vadd.f32 %v918_v34, %v2128_v32  ;;  %v2242_v32 = vld [vmem:[#allocation2 + $0x99] sm:$0xff] }
  0xca   : > { %2914 = vst [vmem:[#allocation30_spill] sm:$0xff] %v2197_v25  ;;  %v2207_v25 = vadd.f32 %v830_v46, %v765_v59  ;;  %v661_v46 = vmul.f32 %v1916_v41, %v628_v17  ;;  %v726_v59 = vmul.f32 %v1921_v43, %v693_v33  ;;  %v437_v14 = vpop.f32.mrf.mxu1  ;;  %v2244_v34 = vadd.f32 %v1007_v24, %v942_v3  ;;  %v2264_v24 = vld [vmem:[#allocation2 + $0x92] sm:$0xff] }
  0xcb   : > { %2915 = vst [vmem:[#allocation31_spill] sm:$0xff] %v2200_v27  ;;  %v926_v27 = vmul.f32 %v1950_v63, %v636_v23  ;;  %v1487_v26 = vmax.f32 %v1455_v2, 0.0  ;;  %v750_v2 = vadd.f32 %v718_v7, %v653_v39  ;;  %v935_v30 = vadd.f32 %v903_v29, %v2056_v42  ;;  %v2266_v29 = vld [vmem:[#allocation2 + $0x9a] sm:$0xff] }
  0xcc   : > { %2916 = vst [vmem:[#allocation32_spill] sm:$0xff] %v2210_v12  ;;  %v417_v12 = vpop.f32.mrf.mxu0  ;;  %v2254_v39 = vadd.f32 %v1015_v38, %v950_v11  ;;  %v2257_v42 = vmul.f32 %v1979_v36, %v636_v23  ;;  %v2260_v5 = vmul.f32 %v1982_v37, %v701_v47  ;;  %v1000_v7 = vmul.f32 %v1967_v22, %v2097_v18  ;;  %v2289_v38 = vld [vmem:[#allocation2 + $0xf8] sm:$0xff] }
  0xcd   : > { %1519 = vst.msk [vmem:[%s2194_s12] sm:$0xff] %vm1518_vm4, %v1486_v56  ;;  %v669_v56 = vmul.f32 %v1916_v41, %v636_v23  ;;  %v958_v28 = vadd.f32 %v926_v27, %v861_v6  ;;  %v2249_v6 = vmul.f32 %v1979_v36, %v628_v17  ;;  %v2252_v27 = vmul.f32 %v1982_v37, %v693_v33  ;;  %v477_v11 = vpop.f32.mrf.mxu3 }
  0xce   : > { %2917 = vst [vmem:[#allocation33_spill] sm:$0xff] %v2225_v1  ;;  %v654_v33 = vmul.f32 %v1916_v41, %v2240_v16  ;;  %v719_v23 = vmul.f32 %v1921_v43, %v2242_v32  ;;  %v1097_v47 = vmul.f32 %v1990_v48, %v2118_v35  ;;  %v911_v18 = vmul.f32 %v1950_v63, %v2240_v16 }
  0xcf   : > { %2918 = vst [vmem:[#allocation34_spill] sm:$0xff] %v2228_v21  ;;  %v2246_v21 = vadd.f32 %v726_v59, %v661_v46  ;;  %v2268_v17 = vadd.f32 %v734_v0, %v669_v56  ;;  %v2270_v3 = vadd.f32 %v1023_v40, %v958_v28  ;;  %v1032_v46 = vadd.f32 %v1000_v7, %v935_v30 }
  0xd0   : > { %1520 = vst.msk [vmem:[%s2194_s12 + $0x8] sm:$0xff] %vm1518_vm4, %v1487_v26  ;;  %v2278_v59 = vadd.f32 %v1096_v31, %v1031_v4  ;;  %v457_v26 = vpop.f32.mrf.mxu2  ;;  %v815_v40 = vmul.f32 %v1938_v53, %v2264_v24  ;;  %v816_v56 = vmul.f32 %v1938_v53, %v2266_v29  ;;  %v489_v0 = vmax.f32 %v2073_v62, 0.0 }
  0xd1   : > { %2919 = vst [vmem:[#allocation35_spill] sm:$0xff] %v2249_v6  ;;  %v436_v28 = vadd.f32 %v1858_v19, %v2161_v10  ;;  %v456_v35 = vadd.f32 %v1858_v19, %v455_v52  ;;  %v476_v4 = vadd.f32 %v1858_v19, %v475_v51  ;;  %v418_v30 = vadd.f32 %v1858_v19, %v417_v12  ;;  %v694_v6 = vld [vmem:[#allocation2 + $0xf9] sm:$0xff] }
  0xd2   : > { %2920 = vst [vmem:[#allocation36_spill] sm:$0xff] %v2252_v27  ;;  %v438_v31 = vadd.f32 %v1858_v19, %v437_v14  ;;  %v751_v7 = vadd.f32 %v719_v23, %v654_v33  ;;  %v478_v62 = vadd.f32 %v1858_v19, %v477_v11  ;;  %v943_v10 = vadd.f32 %v911_v18, %v2099_v20  ;;  %v440_v51 = vpop.f32.mrf.mxu1  ;;  %v790_v11 = vld [vmem:[#allocation2 + $0xf2] sm:$0xff] }
  0xd3   : > { %2921 = vst [vmem:[#allocation37_spill] sm:$0xff] %v2257_v42  ;;  %v458_v42 = vadd.f32 %v1858_v19, %v457_v26  ;;  %v505_v1 = vmax.f32 %v456_v35, 0.0  ;;  %v513_v52 = vmax.f32 %v476_v4, 0.0  ;;  %v490_v13 = vmax.f32 %v418_v30, 0.0 }
  0xd4   : > { %2922 = vst [vmem:[#allocation38_spill] sm:$0xff] %v2260_v5  ;;  %v497_v5 = vmax.f32 %v436_v28, 0.0  ;;  %v420_v27 = vpop.f32.mrf.mxu0  ;;  %v919_v12 = vmul.f32 %v1950_v63, %v2289_v38  ;;  %v498_v14 = vmax.f32 %v438_v31, 0.0  ;;  %v441_v23 = vadd.f32 %v1858_v19, %v440_v51 }
  0xd5   : > { %578 = vst.msk [vmem:[#allocation2 + $0x49] sm:$0xff] %vm517_vm2, %v489_v0  ;;  %v421_v33 = vadd.f32 %v1858_v19, %v420_v27  ;;  %v2304_v26 = vadd.f32 %v1097_v47, %v1032_v46  ;;  %v1008_v20 = vmul.f32 %v1967_v22, %v2242_v32  ;;  %v1104_v18 = vmul.f32 %v1990_v48, %v2264_v24  ;;  %v637_v19 = vld [vmem:[#allocation2 + $0x158] sm:$0xff] }
  0xd6   : > { %586 = vst.msk [vmem:[#allocation2 + $0xa9] sm:$0xff] %vm517_vm2, %v497_v5  ;;  %v506_v0 = vmax.f32 %v458_v42, 0.0  ;;  %v2311_v28 = vadd.f32 %v815_v40, %v750_v2  ;;  %v662_v5 = vmul.f32 %v1916_v41, %v2289_v38  ;;  %v727_v27 = vmul.f32 %v1921_v43, %v694_v6  ;;  %v702_v46 = vld [vmem:[#allocation2 + $0x159] sm:$0xff] }
  0xd7   : > { %594 = vst.msk [vmem:[#allocation2 + $0x109] sm:$0xff] %vm517_vm2, %v505_v1  ;;  %v514_v47 = vmax.f32 %v478_v62, 0.0  ;;  %v2317_v35 = vadd.f32 %v816_v56, %v751_v7  ;;  %v1040_v4 = vadd.f32 %v1008_v20, %v943_v10  ;;  %v1105_v30 = vmul.f32 %v1990_v48, %v2266_v29  ;;  %v791_v42 = vld [vmem:[#allocation2 + $0xfa] sm:$0xff] }
  0xd8   : > { %602 = vst.msk [vmem:[#allocation2 + $0x169] sm:$0xff] %vm517_vm2, %v513_v52  ;;  %v491_v1 = vmax.f32 %v421_v33, 0.0  ;;  %v2324_v2 = vmul.f32 %v1979_v36, %v2240_v16  ;;  %v823_v40 = vmul.f32 %v1938_v53, %v790_v11  ;;  %v951_v31 = vadd.f32 %v919_v12, %v2138_v44  ;;  %v798_v52 = vld [vmem:[#allocation2 + $0x152] sm:$0xff] }
  0xd9   : > { %579 = vst.msk [vmem:[#allocation2 + $0x51] sm:$0xff] %vm517_vm2, %v490_v13  ;;  %v499_v56 = vmax.f32 %v441_v23, 0.0  ;;  %v1136_v7 = vadd.f32 %v1104_v18, %v2244_v34  ;;  %v1112_v62 = vmul.f32 %v1990_v48, %v790_v11  ;;  %v670_v10 = vmul.f32 %v1916_v41, %v637_v19 }
  0xda   : > { %2923 = vst [vmem:[#allocation39_spill] sm:$0xff] %v2324_v2  ;;  %v735_v13 = vmul.f32 %v1921_v43, %v702_v46  ;;  %v2336_v16 = vmul.f32 %v1982_v37, %v2242_v32  ;;  %v759_v51 = vadd.f32 %v727_v27, %v662_v5  ;;  %v1016_v44 = vmul.f32 %v1967_v22, %v694_v6 }
  0xdb   : > { %587 = vst.msk [vmem:[#allocation2 + $0xb1] sm:$0xff] %vm517_vm2, %v498_v14  ;;  %v927_v12 = vmul.f32 %v1950_v63, %v637_v19  ;;  %v2341_v34 = vadd.f32 %v1105_v30, %v1040_v4  ;;  %v2345_v14 = vmul.f32 %v2061_v45, %v2264_v24  ;;  %v2349_v33 = vmul.f32 %v2061_v45, %v2266_v29 }
  0xdc   : > { %595 = vst.msk [vmem:[#allocation2 + $0x111] sm:$0xff] %vm517_vm2, %v506_v0  ;;  %v824_v32 = vmul.f32 %v1938_v53, %v791_v42  ;;  %v2354_v23 = vadd.f32 %v823_v40, %v2246_v21  ;;  %v1048_v20 = vadd.f32 %v1016_v44, %v951_v31  ;;  %v1113_v18 = vmul.f32 %v1990_v48, %v791_v42  ;;  %v799_v0 = vld [vmem:[#allocation2 + $0x15a] sm:$0xff]  ;;  %v614_v27 = vld [vmem:[#allocation2 + $0x48] sm:$0xff] }
  0xdd   : > { %2924 = vst [vmem:[#allocation40_spill] sm:$0xff] %v2336_v16  ;;  %v831_v5 = vmul.f32 %v1938_v53, %v798_v52  ;;  %v2360_v24 = vadd.f32 %v1112_v62, %v2254_v39  ;;  %v2364_v29 = vmul.f32 %v1979_v36, %v2289_v38  ;;  %v767_v21 = vadd.f32 %v735_v13, %v670_v10  ;;  %v622_v31 = vld [vmem:[#allocation2 + $0xa8] sm:$0xff] }
  0xde   : > { %603 = vst.msk [vmem:[#allocation2 + $0x171] sm:$0xff] %vm517_vm2, %v514_v47  ;;  %v2367_v47 = vmul.f32 %v1982_v37, %v694_v6  ;;  %v2369_v4 = vadd.f32 %v824_v32, %v759_v51  ;;  %v2372_v30 = vmul.f32 %v2061_v45, %v790_v11  ;;  %v1120_v40 = vmul.f32 %v1990_v48, %v798_v52 }
  0xdf   : > { %2925 = vst [vmem:[#allocation41_spill] sm:$0xff] %v2345_v14  ;;  %v2377_v39 = vmul.f32 %v2061_v45, %v791_v42  ;;  %v832_v38 = vmul.f32 %v1938_v53, %v799_v0  ;;  %v904_v6 = vmul.f32 %v1950_v63, %v614_v27  ;;  %v2382_v62 = vadd.f32 %v1113_v18, %v1048_v20 }
  0xe0   : > { %2926 = vst [vmem:[#allocation42_spill] sm:$0xff] %v2349_v33  ;;  %v2385_v10 = vadd.f32 %v831_v5, %v2268_v17  ;;  %v1121_v11 = vmul.f32 %v1990_v48, %v799_v0  ;;  %v1194_v13 = vmul.f32 %v1979_v36, %v614_v27  ;;  %v2392_v42 = vmul.f32 %v1979_v36, %v637_v19  ;;  %v687_v5 = vld [vmem:[#allocation2 + $0xa9] sm:$0xff] }
  0xe1   : > { %580 = vst.msk [vmem:[#allocation2 + $0x61] sm:$0xff] %vm517_vm2, %v491_v1  ;;  %v959_v1 = vadd.f32 %v927_v12, %v2207_v25  ;;  %v679_v25 = vld [vmem:[#allocation2 + $0x49] sm:$0xff]  ;;  %v2389_v51 = vadd.f32 %v832_v38, %v767_v21  ;;  %v912_v44 = vmul.f32 %v1950_v63, %v622_v31  ;;  %v1202_v12 = vmul.f32 %v1979_v36, %v622_v31 }
  0xe2   : > { %588 = vst.msk [vmem:[#allocation2 + $0xc1] sm:$0xff] %vm517_vm2, %v499_v56  ;;  %v1024_v56 = vmul.f32 %v1967_v22, %v702_v46  ;;  %v2397_v20 = vadd.f32 %v1120_v40, %v2270_v3  ;;  %v2400_v17 = vmul.f32 %v1982_v37, %v702_v46  ;;  %v2403_v18 = vmul.f32 %v2061_v45, %v798_v52  ;;  %v695_v52 = vld [vmem:[#allocation2 + $0x109] sm:$0xff]  ;;  %v2465_v2 = vld [vmem:[#allocation2 + $0xb2] sm:$0xff] }
  0xe3   : > { %2927 = vst [vmem:[#allocation43_spill] sm:$0xff] %v2364_v29  ;;  %v647_v21 = vmul.f32 %v1916_v41, %v614_v27  ;;  %v712_v19 = vmul.f32 %v1921_v43, %v679_v25  ;;  %v936_v38 = vadd.f32 %v904_v6, %v2147_v15  ;;  %v1291_v3 = vmul.f32 %v1982_v37, %v679_v25  ;;  %v615_v15 = vld [vmem:[#allocation2 + $0x50] sm:$0xff] }
  0xe4   : > { %2928 = vst [vmem:[#allocation44_spill] sm:$0xff] %v2367_v47  ;;  %v1056_v32 = vadd.f32 %v1024_v56, %v959_v1  ;;  %v1226_v1 = vadd.f32 %v1194_v13, %v2278_v59  ;;  %v655_v46 = vmul.f32 %v1916_v41, %v622_v31  ;;  %v720_v40 = vmul.f32 %v1921_v43, %v687_v5 }
  0xe5   : > { %2929 = vst [vmem:[#allocation45_spill] sm:$0xff] %v2372_v30  ;;  %v944_v56 = vadd.f32 %v912_v44, %v2311_v28  ;;  %v1009_v27 = vmul.f32 %v1967_v22, %v687_v5  ;;  %v2419_v30 = vmul.f32 %v2061_v45, %v799_v0  ;;  %v2425_v13 = vadd.f32 %v712_v19, %v647_v21 }
  0xe6   : > { %2930 = vst [vmem:[#allocation46_spill] sm:$0xff] %v2377_v39  ;;  %v630_v39 = vld [vmem:[#allocation2 + $0x108] sm:$0xff]  ;;  %v2416_v6 = vadd.f32 %v1121_v11, %v1056_v32  ;;  %v728_v44 = vmul.f32 %v1921_v43, %v695_v52  ;;  %v1323_v11 = vadd.f32 %v1291_v3, %v1226_v1  ;;  %v2431_v32 = vadd.f32 %v720_v40, %v655_v46 }
  0xe7   : > { %2931 = vst [vmem:[#allocation47_spill] sm:$0xff] %v2392_v42  ;;  %v1001_v42 = vmul.f32 %v1967_v22, %v679_v25  ;;  %v920_v59 = vmul.f32 %v1950_v63, %v630_v39  ;;  %v1210_v31 = vmul.f32 %v1979_v36, %v630_v39  ;;  %v2423_v25 = vld [vmem:[#allocation2 + $0x4a] sm:$0xff]  ;;  %v1017_v0 = vmul.f32 %v1967_v22, %v695_v52 }
  0xe8   : > { %2932 = vst [vmem:[#allocation48_spill] sm:$0xff] %v2400_v17  ;;  %v1299_v17 = vmul.f32 %v1982_v37, %v687_v5  ;;  %v638_v5 = vld [vmem:[#allocation2 + $0x168] sm:$0xff]  ;;  %v2435_v47 = vadd.f32 %v1009_v27, %v944_v56  ;;  %v1307_v21 = vmul.f32 %v1982_v37, %v695_v52  ;;  %v623_v56 = vld [vmem:[#allocation2 + $0xb0] sm:$0xff]  ;;  %v905_v14 = vmul.f32 %v1950_v63, %v615_v15 }
  0xe9   : > { %2933 = vst [vmem:[#allocation49_spill] sm:$0xff] %v2403_v18  ;;  %v1234_v18 = vadd.f32 %v1202_v12, %v1136_v7  ;;  %v2427_v28 = vadd.f32 %v1001_v42, %v936_v38  ;;  %v663_v7 = vmul.f32 %v1916_v41, %v630_v39  ;;  %v680_v12 = vld [vmem:[#allocation2 + $0x51] sm:$0xff]  ;;  %v1388_v39 = vmul.f32 %v2061_v45, %v2423_v25  ;;  %v703_v1 = vld [vmem:[#allocation2 + $0x169] sm:$0xff] }
  0xea   : > { %2934 = vst [vmem:[#allocation50_spill] sm:$0xff] %v2419_v30  ;;  %v1195_v30 = vmul.f32 %v1979_v36, %v615_v15  ;;  %v2438_v42 = vld [vmem:[#allocation2 + $0x52] sm:$0xff]  ;;  %v952_v19 = vadd.f32 %v920_v59, %v2354_v23  ;;  %v1242_v38 = vadd.f32 %v1210_v31, %v2360_v24  ;;  %v1292_v46 = vmul.f32 %v1982_v37, %v680_v12  ;;  %v2454_v59 = vld [vmem:[#allocation2 + $0xaa] sm:$0xff] }
  0xeb   : > { %v1331_v29 = vadd.f32 %v1299_v17, %v1234_v18  ;;  %v2446_v40 = vadd.f32 %v728_v44, %v663_v7  ;;  %v671_v17 = vmul.f32 %v1916_v41, %v638_v5  ;;  %v928_v18 = vmul.f32 %v1950_v63, %v638_v5  ;;  %v688_v44 = vld [vmem:[#allocation2 + $0xb1] sm:$0xff] }
  0xec   : > { %v1227_v3 = vadd.f32 %v1195_v30, %v2304_v26  ;;  %v1420_v52 = vadd.f32 %v1388_v39, %v1323_v11  ;;  %v736_v27 = vmul.f32 %v1921_v43, %v703_v1  ;;  %v1218_v33 = vmul.f32 %v1979_v36, %v638_v5 }
  0xed   : > { %v1389_v24 = vmul.f32 %v2061_v45, %v2438_v42  ;;  %v1025_v26 = vmul.f32 %v1967_v22, %v703_v1  ;;  %v1315_v30 = vmul.f32 %v1982_v37, %v703_v1  ;;  %v648_v31 = vmul.f32 %v1916_v41, %v615_v15 }
  0xee   : > { %v1324_v23 = vadd.f32 %v1292_v46, %v1227_v3  ;;  %v1456_v7 = vadd.f32 %v2159_v58, %v1420_v52  ;;  %v2460_v11 = vadd.f32 %v1017_v0, %v952_v19  ;;  %v1339_v39 = vadd.f32 %v1307_v21, %v1242_v38 }
  0xef   : > { %v1203_v3 = vmul.f32 %v1979_v36, %v623_v56  ;;  %v960_v46 = vadd.f32 %v928_v18, %v2385_v10  ;;  %v1396_v1 = vmul.f32 %v2061_v45, %v2454_v59  ;;  %v1250_v52 = vadd.f32 %v1218_v33, %v2397_v20 }
  0xf0   : > { %v1421_v5 = vadd.f32 %v1389_v24, %v1324_v23  ;;  %v1488_v16 = vmax.f32 %v1456_v7, 0.0  ;;  %v1300_v21 = vmul.f32 %v1982_v37, %v688_v44  ;;  %v2473_v38 = vadd.f32 %v736_v27, %v671_v17  ;;  %v631_v24 = vld [vmem:[#allocation2 + $0x110] sm:$0xff] }
  0xf1   : > { %v1235_v19 = vadd.f32 %v1203_v3, %v2341_v34  ;;  %v713_v10 = vmul.f32 %v1921_v43, %v680_v12  ;;  %v809_v15 = vmul.f32 %v1938_v53, %v2423_v25  ;;  %v1428_v18 = vadd.f32 %v1396_v1, %v1331_v29  ;;  %v2489_v3 = vld [vmem:[#allocation2 + $0x10a] sm:$0xff] }
  0xf2   : > { %v1457_v0 = vadd.f32 %v2159_v58, %v1421_v5  ;;  %1521 = vst.msk [vmem:[%s2194_s12 + $0x10] sm:$0xff] %vm1518_vm4, %v1488_v16  ;;  %v810_v33 = vmul.f32 %v1938_v53, %v2438_v42  ;;  %v1397_v34 = vmul.f32 %v2061_v45, %v2465_v2  ;;  %v2484_v17 = vadd.f32 %v1025_v26, %v960_v46  ;;  %v696_v26 = vld [vmem:[#allocation2 + $0x111] sm:$0xff] }
  0xf3   : > { %v1332_v23 = vadd.f32 %v1300_v21, %v1235_v19  ;;  %v937_v27 = vadd.f32 %v905_v14, %v2152_v57  ;;  %v1002_v7 = vmul.f32 %v1967_v22, %v680_v12  ;;  %v1464_v5 = vadd.f32 %v2159_v58, %v1428_v18 }
  0xf4   : > { %v1489_v20 = vmax.f32 %v1457_v0, 0.0  ;;  %v1347_v16 = vadd.f32 %v1315_v30, %v1250_v52  ;;  %v1098_v29 = vmul.f32 %v1990_v48, %v2423_v25  ;;  %v656_v1 = vmul.f32 %v1916_v41, %v623_v56  ;;  %v793_v52 = vld [vmem:[#allocation2 + $0x112] sm:$0xff] }
  0xf5   : > { %v1429_v0 = vadd.f32 %v1397_v34, %v1332_v23  ;;  %v721_v46 = vmul.f32 %v1921_v43, %v688_v44  ;;  %v913_v57 = vmul.f32 %v1950_v63, %v623_v56  ;;  %v1496_v14 = vmax.f32 %v1464_v5, 0.0  ;;  %v639_v5 = vld [vmem:[#allocation2 + $0x170] sm:$0xff] }
  0xf6   : > { %1522 = vst.msk [vmem:[%s2194_s12 + $0x18] sm:$0xff] %vm1518_vm4, %v1489_v20  ;;  %v1211_v12 = vmul.f32 %v1979_v36, %v631_v24  ;;  %v745_v19 = vadd.f32 %v713_v10, %v648_v31  ;;  %v2500_v30 = vadd.f32 %v809_v15, %v2425_v13  ;;  %v1404_v21 = vmul.f32 %v2061_v45, %v2489_v3 }
  0xf7   : > { %v1465_v25 = vadd.f32 %v2159_v58, %v1429_v0  ;;  %v1034_v18 = vadd.f32 %v1002_v7, %v937_v27  ;;  %v1099_v20 = vmul.f32 %v1990_v48, %v2438_v42  ;;  %1529 = vst.msk [vmem:[%s2194_s12 + $0x50] sm:$0xff] %vm1518_vm4, %v1496_v14  ;;  %v1308_v31 = vmul.f32 %v1982_v37, %v696_v26  ;;  %v460_v0 = vpop.f32.mrf.mxu2 }
  0xf8   : > { %v1243_v56 = vadd.f32 %v1211_v12, %v2382_v62  ;;  %v2512_v13 = vadd.f32 %v1098_v29, %v2427_v28  ;;  %v817_v10 = vmul.f32 %v1938_v53, %v2454_v59  ;;  %v1436_v23 = vadd.f32 %v1404_v21, %v1339_v39  ;;  %v2526_v39 = vld [vmem:[#allocation2 + $0x16a] sm:$0xff] }
  0xf9   : > { %v1497_v15 = vmax.f32 %v1465_v25, 0.0  ;;  %v753_v34 = vadd.f32 %v721_v46, %v656_v1  ;;  %v945_v27 = vadd.f32 %v913_v57, %v2317_v35  ;;  %v1405_v42 = vmul.f32 %v2061_v45, %v793_v52  ;;  %v704_v57 = vld [vmem:[#allocation2 + $0x171] sm:$0xff] }
  0xfa   : > { %v1340_v7 = vadd.f32 %v1308_v31, %v1243_v56  ;;  %v2518_v14 = vadd.f32 %v810_v33, %v745_v19  ;;  %v818_v62 = vmul.f32 %v1938_v53, %v2465_v2  ;;  %v1010_v28 = vmul.f32 %v1967_v22, %v688_v44 }
  0xfb   : > { %1530 = vst.msk [vmem:[%s2194_s12 + $0x58] sm:$0xff] %vm1518_vm4, %v1497_v15  ;;  %v1472_v29 = vadd.f32 %v2159_v58, %v1436_v23  ;;  %v2528_v1 = vadd.f32 %v1099_v20, %v1034_v18  ;;  %v1106_v35 = vmul.f32 %v1990_v48, %v2454_v59  ;;  %v921_v33 = vmul.f32 %v1950_v63, %v631_v24  ;;  %v2546_v20 = vld [vmem:[#allocation2 + $0x172] sm:$0xff]  ;;  %v480_v15 = vpop.f32.mrf.mxu3 }
  0xfc   : > { %v1437_v46 = vadd.f32 %v1405_v42, %v1340_v7  ;;  %v2534_v12 = vadd.f32 %v817_v10, %v2431_v32  ;;  %v2538_v44 = vmul.f32 %v1990_v48, %v2465_v2  ;;  %v1219_v25 = vmul.f32 %v1979_v36, %v639_v5 }
  0xfd   : > { %v1504_v19 = vmax.f32 %v1472_v29, 0.0  ;;  %v2541_v21 = vadd.f32 %v818_v62, %v753_v34  ;;  %v2543_v18 = vadd.f32 %v1010_v28, %v945_v27  ;;  %v1412_v56 = vmul.f32 %v2061_v45, %v2526_v39 }
  0xfe   : > { %v1473_v59 = vadd.f32 %v2159_v58, %v1437_v46  ;;  %v664_v32 = vmul.f32 %v1916_v41, %v631_v24  ;;  %v729_v2 = vmul.f32 %v1921_v43, %v696_v26  ;;  %v1251_v31 = vadd.f32 %v1219_v25, %v2416_v6  ;;  %v422_v46 = vpop.f32.mrf.mxu0 }
  0xff   : > { %2935 = vst [vmem:[#allocation51_spill] sm:$0xff] %v2541_v21  ;;  %v1316_v10 = vmul.f32 %v1982_v37, %v704_v57  ;;  %v2557_v23 = vadd.f32 %v1106_v35, %v2435_v47  ;;  %v953_v34 = vadd.f32 %v921_v33, %v2369_v4  ;;  %v1444_v7 = vadd.f32 %v1412_v56, %v1347_v16  ;;  %v616_v56 = vld [vmem:[#allocation2 + $0x60] sm:$0xff] }
 0x100   : > { %1537 = vst.msk [vmem:[%s2194_s12 + $0x90] sm:$0xff] %vm1518_vm4, %v1504_v19  ;;  %v1505_v27 = vmax.f32 %v1473_v59, 0.0  ;;  %v672_v42 = vmul.f32 %v1916_v41, %v639_v5  ;;  %v737_v24 = vmul.f32 %v1921_v43, %v704_v57  ;;  %v1413_v28 = vmul.f32 %v2061_v45, %v2546_v20 }
 0x101   : > { %v1348_v62 = vadd.f32 %v1316_v10, %v1251_v31  ;;  %v2566_v6 = vmul.f32 %v1938_v53, %v2489_v3  ;;  %v1018_v29 = vmul.f32 %v1967_v22, %v696_v26  ;;  %v929_v47 = vmul.f32 %v1950_v63, %v639_v5  ;;  %v442_v5 = vpop.f32.mrf.mxu1  ;;  %v462_v31 = vpop.f32.mrf.mxu2 }
 0x102   : > { %1538 = vst.msk [vmem:[%s2194_s12 + $0x98] sm:$0xff] %vm1518_vm4, %v1505_v27  ;;  %v1480_v4 = vadd.f32 %v2159_v58, %v1444_v7  ;;  %v761_v16 = vadd.f32 %v729_v2, %v664_v32  ;;  %v826_v35 = vmul.f32 %v1938_v53, %v793_v52  ;;  %v1114_v33 = vmul.f32 %v1990_v48, %v2489_v3 }
 0x103   : > { %v1445_v45 = vadd.f32 %v1413_v28, %v1348_v62  ;;  %v1050_v19 = vadd.f32 %v1018_v29, %v953_v34  ;;  %v1115_v25 = vmul.f32 %v1990_v48, %v793_v52  ;;  %v833_v26 = vmul.f32 %v1938_v53, %v2526_v39  ;;  %v624_v52 = vld [vmem:[#allocation2 + $0xc0] sm:$0xff] }
 0x104   : > { %v1512_v59 = vmax.f32 %v1480_v4, 0.0  ;;  %v769_v10 = vadd.f32 %v737_v24, %v672_v42  ;;  %v834_v32 = vmul.f32 %v1938_v53, %v2546_v20  ;;  %v1026_v2 = vmul.f32 %v1967_v22, %v704_v57  ;;  %v1730_v34 = vld [vmem:[%s2881_s2] ss:$0 sm:$0xff]  ;;  %v681_v4 = vld [vmem:[#allocation2 + $0x61] sm:$0xff] }
 0x105   : > { %v1481_v3 = vadd.f32 %v2159_v58, %v1445_v45  ;;  %v961_v27 = vadd.f32 %v929_v47, %v2389_v51  ;;  %v461_v7 = vadd.f32 %v1730_v34, %v460_v0  ;;  %v481_v62 = vadd.f32 %v1730_v34, %v480_v15 }
 0x106   : > { %1545 = vst.msk [vmem:[%s2194_s12 + $0xd0] sm:$0xff] %vm1518_vm4, %v1512_v59  ;;  %v423_v42 = vadd.f32 %v1730_v34, %v422_v46  ;;  %v906_v28 = vmul.f32 %v1950_v63, %v616_v56  ;;  %v443_v29 = vadd.f32 %v1730_v34, %v442_v5  ;;  %v463_v57 = vadd.f32 %v1730_v34, %v462_v31  ;;  %v689_v31 = vld [vmem:[#allocation2 + $0xc1] sm:$0xff] }
 0x107   : > { %v1513_v24 = vmax.f32 %v1481_v3, 0.0  ;;  %v1196_v45 = vmul.f32 %v1979_v36, %v616_v56  ;;  %v507_v51 = vmax.f32 %v461_v7, 0.0  ;;  %v515_v47 = vmax.f32 %v481_v62, 0.0  ;;  %v482_v3 = vpop.f32.mrf.mxu3 }
 0x108   : > { %v492_v59 = vmax.f32 %v423_v42, 0.0  ;;  %v1122_v21 = vmul.f32 %v1990_v48, %v2526_v39  ;;  %v914_v0 = vmul.f32 %v1950_v63, %v624_v52  ;;  %v1204_v15 = vmul.f32 %v1979_v36, %v624_v52 }
 0x109   : > { %1546 = vst.msk [vmem:[%s2194_s12 + $0xd8] sm:$0xff] %vm1518_vm4, %v1513_v24  ;;  %v500_v46 = vmax.f32 %v443_v29, 0.0  ;;  %v1058_v9 = vadd.f32 %v1026_v2, %v961_v27  ;;  %v649_v5 = vmul.f32 %v1916_v41, %v616_v56  ;;  %v508_v7 = vmax.f32 %v463_v57, 0.0 }
 0x10a   : > { %596 = vst.msk [vmem:[#allocation2 + $0x121] sm:$0xff] %vm517_vm2, %v507_v51  ;;  %v483_v62 = vadd.f32 %v1730_v34, %v482_v3  ;;  %v714_v42 = vmul.f32 %v1921_v43, %v681_v4  ;;  %v938_v39 = vadd.f32 %v906_v28, %v2500_v30  ;;  %v1003_v24 = vmul.f32 %v1967_v22, %v681_v4 }
 0x10b   : > { %v1293_v58 = vmul.f32 %v1982_v37, %v681_v4  ;;  %604 = vst.msk [vmem:[#allocation2 + $0x181] sm:$0xff] %vm517_vm2, %v515_v47  ;;  %v1228_v29 = vadd.f32 %v1196_v45, %v2512_v13  ;;  %v657_v2 = vmul.f32 %v1916_v41, %v624_v52  ;;  %v722_v56 = vmul.f32 %v1921_v43, %v689_v31 }
 0x10c   : > { %581 = vst.msk [vmem:[#allocation2 + $0x69] sm:$0xff] %vm517_vm2, %v492_v59  ;;  %v516_v27 = vmax.f32 %v483_v62, 0.0  ;;  %v946_v34 = vadd.f32 %v914_v0, %v2534_v12  ;;  %v1011_v57 = vmul.f32 %v1967_v22, %v689_v31  ;;  %v1236_v30 = vadd.f32 %v1204_v15, %v2557_v23 }
 0x10d   : > { %v1301_v28 = vmul.f32 %v1982_v37, %v689_v31  ;;  %589 = vst.msk [vmem:[#allocation2 + $0xc9] sm:$0xff] %vm517_vm2, %v500_v46  ;;  %v2615_v13 = vadd.f32 %v2538_v44, %v2543_v18  ;;  %v857_v52 = vadd.f32 %v2566_v6, %v2446_v40  ;;  %v2619_v4 = vadd.f32 %v826_v35, %v761_v16 }
 0x10e   : > { %v1123_v12 = vmul.f32 %v1990_v48, %v2546_v20  ;;  %597 = vst.msk [vmem:[#allocation2 + $0x129] sm:$0xff] %vm517_vm2, %v508_v7  ;;  %v1146_v23 = vadd.f32 %v1114_v33, %v2460_v11  ;;  %v2625_v45 = vadd.f32 %v1115_v25, %v1050_v19  ;;  %v865_v51 = vadd.f32 %v833_v26, %v2473_v38 }
 0x10f   : > { %v2628_v47 = vadd.f32 %v834_v32, %v769_v10  ;;  %605 = vst.msk [vmem:[#allocation2 + $0x189] sm:$0xff] %vm517_vm2, %v516_v27  ;;  %v1154_v44 = vadd.f32 %v1122_v21, %v2484_v17  ;;  %v746_v18 = vadd.f32 %v714_v42, %v649_v5  ;;  %v1035_v6 = vadd.f32 %v1003_v24, %v938_v39 }
 0x110   : > { %v2632_v40 = vadd.f32 %v1123_v12, %v1058_v9  ;;  %v1325_v16 = vadd.f32 %v1293_v58, %v1228_v29  ;;  %v2634_v20 = vadd.f32 %v722_v56, %v657_v2  ;;  %v2636_v35 = vadd.f32 %v1011_v57, %v946_v34 }
 0x111   : > { %v2638_v11 = vadd.f32 %v1301_v28, %v1236_v30  ;;  %v632_v33 = vld [vmem:[#allocation2 + $0x120] sm:$0xff] }
 0x112   : > { %v697_v19 = vld [vmem:[#allocation2 + $0x121] sm:$0xff]  ;;  %v665_v38 = vmul.f32 %v1916_v41, %v632_v33  ;;  %v922_v26 = vmul.f32 %v1950_v63, %v632_v33  ;;  %v1212_v58 = vmul.f32 %v1979_v36, %v632_v33 }
 0x113   : > { %v730_v25 = vmul.f32 %v1921_v43, %v697_v19  ;;  %v1019_v9 = vmul.f32 %v1967_v22, %v697_v19  ;;  %v897_v17 = vld [vmem:[#allocation2 + $0x180] sm:$0xff]  ;;  %v1309_v10 = vmul.f32 %v1982_v37, %v697_v19  ;;  %v617_v0 = vld [vmem:[#allocation2 + $0x68] sm:$0xff] }
 0x114   : > { %v994_v21 = vld [vmem:[#allocation2 + $0x181] sm:$0xff]  ;;  %v930_v32 = vmul.f32 %v1950_v63, %v897_v17  ;;  %v682_v15 = vld [vmem:[#allocation2 + $0x69] sm:$0xff]  ;;  %v954_v5 = vadd.f32 %v922_v26, %v857_v52  ;;  %v1220_v31 = vmul.f32 %v1979_v36, %v897_v17  ;;  %v1244_v42 = vadd.f32 %v1212_v58, %v1146_v23 }
 0x115   : > { %v1027_v59 = vmul.f32 %v1967_v22, %v994_v21  ;;  %v778_v46 = vld [vmem:[#allocation2 + $0x62] sm:$0xff]  ;;  %v2648_v3 = vadd.f32 %v730_v25, %v665_v38  ;;  %v1317_v7 = vmul.f32 %v1982_v37, %v994_v21  ;;  %v779_v62 = vld [vmem:[#allocation2 + $0x6a] sm:$0xff]  ;;  %v650_v24 = vmul.f32 %v1916_v41, %v617_v0 }
 0x116   : > { %v962_v39 = vadd.f32 %v930_v32, %v865_v51  ;;  %v715_v29 = vmul.f32 %v1921_v43, %v682_v15  ;;  %v2654_v2 = vadd.f32 %v1019_v9, %v954_v5  ;;  %v1252_v56 = vadd.f32 %v1220_v31, %v1154_v44  ;;  %v2670_v26 = vld [vmem:[#allocation2 + $0xc8] sm:$0xff] }
 0x117   : > { %v811_v27 = vmul.f32 %v1938_v53, %v778_v46  ;;  %v812_v34 = vmul.f32 %v1938_v53, %v779_v62  ;;  %v2658_v57 = vadd.f32 %v1309_v10, %v1244_v42  ;;  %v907_v52 = vmul.f32 %v1950_v63, %v617_v0  ;;  %v2680_v10 = vld [vmem:[#allocation2 + $0xc9] sm:$0xff] }
 0x118   : > { %v2660_v30 = vadd.f32 %v1027_v59, %v962_v39  ;;  %v747_v28 = vadd.f32 %v715_v29, %v650_v24  ;;  %v2663_v12 = vadd.f32 %v1317_v7, %v1252_v56  ;;  %v1004_v51 = vmul.f32 %v1967_v22, %v682_v15 }
 0x119   : > { %v843_v23 = vadd.f32 %v811_v27, %v746_v18  ;;  %v1100_v33 = vmul.f32 %v1990_v48, %v778_v46  ;;  %v939_v44 = vadd.f32 %v907_v52, %v2518_v14  ;;  %v1101_v38 = vmul.f32 %v1990_v48, %v779_v62  ;;  %v2677_v18 = vld [vmem:[%s2882_s3 + $0x8] ss:$0 sm:$0xff] }
 0x11a   : > { %v844_v19 = vadd.f32 %v812_v34, %v747_v28  ;;  %v1197_v25 = vmul.f32 %v1979_v36, %v617_v0  ;;  %v1294_v21 = vmul.f32 %v1982_v37, %v682_v15  ;;  %v1390_v58 = vmul.f32 %v2677_v18, %v778_v46  ;;  %v2939_v28 = vld [vmem:[#allocation33_spill] sm:$0xff] }
 0x11b   : > { %v940_v9 = vadd.f32 %v1995_v54, %v843_v23  ;;  %v1132_v17 = vadd.f32 %v1100_v33, %v1035_v6  ;;  %v1036_v32 = vadd.f32 %v1004_v51, %v939_v44  ;;  %v1391_v0 = vmul.f32 %v2677_v18, %v779_v62  ;;  %v2685_v54 = vld [vmem:[#allocation2 + $0xc2] sm:$0xff] }
 0x11c   : > { %v941_v14 = vadd.f32 %v2067_v49, %v844_v19  ;;  %v1229_v59 = vadd.f32 %v1197_v25, %v2528_v1  ;;  %v1422_v5 = vadd.f32 %v1390_v58, %v1325_v16  ;;  %v658_v31 = vmul.f32 %v1916_v41, %v2670_v26  ;;  %v2694_v1 = vld [vmem:[#allocation2 + $0xca] sm:$0xff]  ;;  %v2942_v44 = vld [vmem:[#allocation13_spill] sm:$0xff] }
 0x11d   : > { %v1037_v6 = vadd.f32 %v1998_v55, %v940_v9  ;;  %v1230_v15 = vadd.f32 %v2003_v60, %v1132_v17  ;;  %v1133_v7 = vadd.f32 %v1101_v38, %v1036_v32  ;;  %v723_v49 = vmul.f32 %v1921_v43, %v2680_v10  ;;  %v2936_v55 = vld [vmem:[#allocation23_spill] sm:$0xff]  ;;  %v2940_v23 = vld [vmem:[#allocation14_spill] sm:$0xff] }
 0x11e   : > { %v1038_v46 = vadd.f32 %v2070_v50, %v941_v14  ;;  %v1326_v42 = vadd.f32 %v1294_v21, %v1229_v59  ;;  %v1458_v24 = vadd.f32 %v2936_v55, %v1422_v5  ;;  %v819_v60 = vmul.f32 %v1938_v53, %v2685_v54  ;;  %v2937_v16 = vld [vmem:[#allocation11_spill] sm:$0xff]  ;;  %v2938_v50 = vld [vmem:[#allocation12_spill] sm:$0xff]  ;;  %v2943_v17 = vld [vmem:[#allocation34_spill] sm:$0xff] }
 0x11f   : > { %v1134_v62 = vadd.f32 %v2078_v8, %v1037_v6  ;;  %v1327_v39 = vadd.f32 %v2006_v61, %v1230_v15  ;;  %v1231_v56 = vadd.f32 %v2938_v50, %v1133_v7  ;;  %v755_v34 = vadd.f32 %v723_v49, %v658_v31  ;;  %v2941_v8 = vld [vmem:[#allocation39_spill] sm:$0xff]  ;;  %v2944_v59 = vld [vmem:[#allocation40_spill] sm:$0xff] }
 0x120   : > { %v1135_v29 = vadd.f32 %v2937_v16, %v1038_v46  ;;  %v1423_v27 = vadd.f32 %v1391_v0, %v1326_v42  ;;  %v1490_v33 = vmax.f32 %v1458_v24, 0.0  ;;  %v820_v61 = vmul.f32 %v1938_v53, %v2694_v1  ;;  %v2945_v6 = vld [vmem:[#allocation15_spill] sm:$0xff] }
 0x121   : > { %v1232_v52 = vadd.f32 %v2939_v28, %v1134_v62  ;;  %v1424_v51 = vadd.f32 %v2940_v23, %v1327_v39  ;;  %v1328_v38 = vadd.f32 %v2942_v44, %v1231_v56  ;;  %v851_v9 = vadd.f32 %v819_v60, %v2634_v20  ;;  %v2946_v31 = vld [vmem:[#allocation3_spill] sm:$0xff]  ;;  %v2947_v20 = vld [vmem:[#allocation41_spill] sm:$0xff]  ;;  %v2949_v39 = vld [vmem:[#allocation16_spill] sm:$0xff] }
 0x122   : > { %v1233_v19 = vadd.f32 %v2941_v8, %v1135_v29  ;;  %v1459_v25 = vadd.f32 %v2936_v55, %v1423_v27  ;;  %1523 = vst.msk [vmem:[%s2194_s12 + $0x20] sm:$0xff] %vm1518_vm4, %v1490_v33  ;;  %v852_v14 = vadd.f32 %v820_v61, %v755_v34  ;;  %v915_v32 = vmul.f32 %v1950_v63, %v2670_v26  ;;  %v2948_v49 = vld [vmem:[#allocation51_spill] sm:$0xff]  ;;  %v2950_v60 = vld [vmem:[#allocation42_spill] sm:$0xff]  ;;  %v2951_v56 = vld [vmem:[#allocation4_spill] sm:$0xff] }
 0x123   : > { %v1329_v21 = vadd.f32 %v2943_v17, %v1232_v52  ;;  %v1460_v58 = vadd.f32 %v2936_v55, %v1424_v51  ;;  %v1425_v15 = vadd.f32 %v2945_v6, %v1328_v38  ;;  %v948_v46 = vadd.f32 %v2946_v31, %v851_v9  ;;  %v2952_v28 = vld [vmem:[#allocation17_spill] sm:$0xff]  ;;  %v2954_v9 = vld [vmem:[#allocation19_spill] sm:$0xff] }
 0x124   : > { %v1330_v0 = vadd.f32 %v2944_v59, %v1233_v19  ;;  %v1491_v5 = vmax.f32 %v1459_v25, 0.0  ;;  %v947_v62 = vadd.f32 %v915_v32, %v2948_v49  ;;  %v949_v24 = vadd.f32 %v2949_v39, %v852_v14  ;;  %v2741_v33 = vld [vmem:[%s2883_s4] ss:$0 sm:$0xff]  ;;  %v2953_v19 = vld [vmem:[#allocation18_spill] sm:$0xff]  ;;  %v2955_v59 = vld [vmem:[#allocation35_spill] sm:$0xff] }
 0x125   : > { %v1426_v7 = vadd.f32 %v2947_v20, %v1329_v21  ;;  %v1492_v42 = vmax.f32 %v1460_v58, 0.0  ;;  %v1461_v29 = vadd.f32 %v2936_v55, %v1425_v15  ;;  %v1012_v50 = vmul.f32 %v1967_v22, %v2680_v10  ;;  %v633_v58 = vld [vmem:[#allocation2 + $0x128] sm:$0xff]  ;;  %v2956_v15 = vld [vmem:[#allocation5_spill] sm:$0xff]  ;;  %v2957_v31 = vld [vmem:[#allocation43_spill] sm:$0xff] }
 0x126   : > { %v1427_v16 = vadd.f32 %v2950_v60, %v1330_v0  ;;  %1524 = vst.msk [vmem:[%s2194_s12 + $0x28] sm:$0xff] %vm1518_vm4, %v1491_v5  ;;  %v1045_v27 = vadd.f32 %v2951_v56, %v948_v46  ;;  %v1046_v52 = vadd.f32 %v2952_v28, %v949_v24  ;;  %v1108_v23 = vmul.f32 %v1990_v48, %v2685_v54  ;;  %v698_v20 = vld [vmem:[#allocation2 + $0x129] sm:$0xff]  ;;  %v2963_v28 = vld [vmem:[#allocation45_spill] sm:$0xff] }
 0x127   : > { %v1462_v34 = vadd.f32 %v2936_v55, %v1426_v7  ;;  %1525 = vst.msk [vmem:[%s2194_s12 + $0x30] sm:$0xff] %vm1518_vm4, %v1492_v42  ;;  %v1109_v51 = vmul.f32 %v1990_v48, %v2694_v1  ;;  %v1493_v55 = vmax.f32 %v1461_v29, 0.0  ;;  %v1044_v8 = vadd.f32 %v1012_v50, %v947_v62  ;;  %v794_v7 = vld [vmem:[#allocation2 + $0x122] sm:$0xff]  ;;  %v2958_v42 = vld [vmem:[#allocation20_spill] sm:$0xff]  ;;  %v795_v56 = vld [vmem:[#allocation2 + $0x12a] sm:$0xff] }
 0x128   : > { %v1463_v61 = vadd.f32 %v2741_v33, %v1427_v16  ;;  %v1142_v44 = vadd.f32 %v2953_v19, %v1045_v27  ;;  %v1140_v25 = vadd.f32 %v1108_v23, %v2636_v35  ;;  %v1143_v17 = vadd.f32 %v2954_v9, %v1046_v52  ;;  %v2959_v62 = vld [vmem:[#allocation36_spill] sm:$0xff]  ;;  %v2960_v60 = vld [vmem:[#allocation6_spill] sm:$0xff]  ;;  %v2962_v27 = vld [vmem:[#allocation21_spill] sm:$0xff] }
 0x129   : > { %v1494_v38 = vmax.f32 %v1462_v34, 0.0  ;;  %v1205_v21 = vmul.f32 %v1979_v36, %v2670_v26  ;;  %1526 = vst.msk [vmem:[%s2194_s12 + $0x38] sm:$0xff] %vm1518_vm4, %v1493_v55  ;;  %v1141_v32 = vadd.f32 %v1109_v51, %v1044_v8  ;;  %v1302_v6 = vmul.f32 %v1982_v37, %v2680_v10  ;;  %v2961_v29 = vld [vmem:[#allocation44_spill] sm:$0xff] }
 0x12a   : > { %v1495_v14 = vmax.f32 %v1463_v61, 0.0  ;;  %v1240_v0 = vadd.f32 %v2955_v59, %v1142_v44  ;;  %v1238_v5 = vadd.f32 %v2956_v15, %v1140_v25  ;;  %v1241_v46 = vadd.f32 %v2957_v31, %v1143_v17  ;;  %v2966_v44 = vld [vmem:[#allocation24_spill] sm:$0xff] }
 0x12b   : > { %1527 = vst.msk [vmem:[%s2194_s12 + $0x40] sm:$0xff] %vm1518_vm4, %v1494_v38  ;;  %v1237_v35 = vadd.f32 %v1205_v21, %v2615_v13  ;;  %v1398_v26 = vmul.f32 %v2677_v18, %v2685_v54  ;;  %v1239_v49 = vadd.f32 %v2958_v42, %v1141_v32  ;;  %v1399_v10 = vmul.f32 %v2677_v18, %v2694_v1  ;;  %v2964_v1 = vld [vmem:[#allocation22_spill] sm:$0xff]  ;;  %v2968_v42 = vld [vmem:[#allocation25_spill] sm:$0xff] }
 0x12c   : > { %1528 = vst.msk [vmem:[%s2194_s12 + $0x48] sm:$0xff] %vm1518_vm4, %v1495_v14  ;;  %v1337_v39 = vadd.f32 %v2959_v62, %v1240_v0  ;;  %v666_v13 = vmul.f32 %v1916_v41, %v633_v58  ;;  %v1335_v16 = vadd.f32 %v2960_v60, %v1238_v5  ;;  %v1338_v50 = vadd.f32 %v2961_v29, %v1241_v46  ;;  %v2965_v41 = vld [vmem:[#allocation46_spill] sm:$0xff]  ;;  %v2967_v46 = vld [vmem:[#allocation7_spill] sm:$0xff]  ;;  %v2969_v60 = vld [vmem:[#allocation8_spill] sm:$0xff] }
 0x12d   : > { %v1334_v24 = vadd.f32 %v1302_v6, %v1237_v35  ;;  %v1430_v54 = vadd.f32 %v1398_v26, %v2638_v11  ;;  %v1336_v34 = vadd.f32 %v2962_v27, %v1239_v49  ;;  %v731_v23 = vmul.f32 %v1921_v43, %v698_v20  ;;  %v2970_v29 = vld [vmem:[#allocation26_spill] sm:$0xff] }
 0x12e   : > { %v1434_v52 = vadd.f32 %v2963_v28, %v1337_v39  ;;  %v827_v51 = vmul.f32 %v1938_v53, %v794_v7  ;;  %v1432_v55 = vadd.f32 %v2964_v1, %v1335_v16  ;;  %v1435_v8 = vadd.f32 %v2965_v41, %v1338_v50 }
 0x12f   : > { %v1431_v61 = vadd.f32 %v1399_v10, %v1334_v24  ;;  %v1466_v19 = vadd.f32 %v2741_v33, %v1430_v54  ;;  %v1433_v38 = vadd.f32 %v2966_v44, %v1336_v34  ;;  %v763_v25 = vadd.f32 %v731_v23, %v666_v13  ;;  %v898_v24 = vld [vmem:[#allocation2 + $0x188] sm:$0xff]  ;;  %v2971_v23 = vld [vmem:[#allocation27_spill] sm:$0xff] }
 0x130   : > { %v1470_v11 = vadd.f32 %v2741_v33, %v1434_v52  ;;  %v828_v9 = vmul.f32 %v1938_v53, %v795_v56  ;;  %v1468_v17 = vadd.f32 %v2741_v33, %v1432_v55  ;;  %v1471_v21 = vadd.f32 %v2741_v33, %v1435_v8  ;;  %v995_v34 = vld [vmem:[#allocation2 + $0x189] sm:$0xff]  ;;  %v2973_v8 = vld [vmem:[#allocation9_spill] sm:$0xff] }
 0x131   : > { %v1467_v43 = vadd.f32 %v2741_v33, %v1431_v61  ;;  %v1498_v14 = vmax.f32 %v1466_v19, 0.0  ;;  %v1469_v32 = vadd.f32 %v2741_v33, %v1433_v38  ;;  %v859_v0 = vadd.f32 %v827_v51, %v2648_v3  ;;  %v2972_v61 = vld [vmem:[#allocation28_spill] sm:$0xff]  ;;  %v1091_v55 = vld [vmem:[#allocation2 + $0x182] sm:$0xff] }
 0x132   : > { %v1502_v59 = vmax.f32 %v1470_v11, 0.0  ;;  %v860_v6 = vadd.f32 %v828_v9, %v763_v25  ;;  %v1500_v15 = vmax.f32 %v1468_v17, 0.0  ;;  %v1503_v5 = vmax.f32 %v1471_v21, 0.0  ;;  %v2976_v17 = vld [vmem:[#allocation29_spill] sm:$0xff]  ;;  %v2977_v21 = vld [vmem:[#allocation10_spill] sm:$0xff] }
 0x133   : > { %v1499_v35 = vmax.f32 %v1467_v43, 0.0  ;;  %1531 = vst.msk [vmem:[%s2194_s12 + $0x60] sm:$0xff] %vm1518_vm4, %v1498_v14  ;;  %v923_v53 = vmul.f32 %v1950_v63, %v633_v58  ;;  %v1501_v31 = vmax.f32 %v1469_v32, 0.0  ;;  %v956_v26 = vadd.f32 %v2967_v46, %v859_v0  ;;  %v1092_v43 = vld [vmem:[#allocation2 + $0x18a] sm:$0xff] }
 0x134   : > { %1535 = vst.msk [vmem:[%s2194_s12 + $0x80] sm:$0xff] %vm1518_vm4, %v1502_v59  ;;  %v957_v49 = vadd.f32 %v2968_v42, %v860_v6  ;;  %v1020_v62 = vmul.f32 %v1967_v22, %v698_v20  ;;  %v1116_v39 = vmul.f32 %v1990_v48, %v794_v7  ;;  %v1117_v10 = vmul.f32 %v1990_v48, %v795_v56  ;;  %v2978_v59 = vld [vmem:[#allocation38_spill] sm:$0xff]  ;;  %v1189_v42 = vld [vmem:[#allocation2 + $0x198] sm:$0xff] }
 0x135   : > { %1532 = vst.msk [vmem:[%s2194_s12 + $0x68] sm:$0xff] %vm1518_vm4, %v1499_v35  ;;  %v955_v3 = vadd.f32 %v923_v53, %v2619_v4  ;;  %v1213_v13 = vmul.f32 %v1979_v36, %v633_v58  ;;  %v1053_v16 = vadd.f32 %v2969_v60, %v956_v26  ;;  %v1310_v54 = vmul.f32 %v1982_v37, %v698_v20 }
 0x136   : > { %1533 = vst.msk [vmem:[%s2194_s12 + $0x70] sm:$0xff] %vm1518_vm4, %v1500_v15  ;;  %v1054_v50 = vadd.f32 %v2970_v29, %v957_v49  ;;  %v1406_v27 = vmul.f32 %v2677_v18, %v794_v7  ;;  %v1148_v28 = vadd.f32 %v1116_v39, %v2654_v2  ;;  %v1407_v58 = vmul.f32 %v2677_v18, %v795_v56  ;;  %v2975_v56 = vld [vmem:[#allocation47_spill] sm:$0xff]  ;;  %v1190_v49 = vld [vmem:[#allocation2 + $0x1a0] sm:$0xff]  ;;  %v2983_v39 = vld [vmem:[#allocation50_spill] sm:$0xff] }
 0x137   : > { %1534 = vst.msk [vmem:[%s2194_s12 + $0x78] sm:$0xff] %vm1518_vm4, %v1501_v31  ;;  %v1052_v4 = vadd.f32 %v1020_v62, %v955_v3  ;;  %v1245_v52 = vadd.f32 %v1213_v13, %v2625_v45  ;;  %v1150_v51 = vadd.f32 %v2971_v23, %v1053_v16  ;;  %v931_v7 = vmul.f32 %v1950_v63, %v898_v24  ;;  %v2974_v45 = vld [vmem:[#allocation37_spill] sm:$0xff]  ;;  %v2981_v31 = vld [vmem:[#allocation31_spill] sm:$0xff]  ;;  %v2984_v16 = vld [vmem:[#allocation32_spill] sm:$0xff] }
 0x138   : > { %1536 = vst.msk [vmem:[%s2194_s12 + $0x88] sm:$0xff] %vm1518_vm4, %v1503_v5  ;;  %v1151_v1 = vadd.f32 %v2972_v61, %v1054_v50  ;;  %v1438_v20 = vadd.f32 %v1406_v27, %v2658_v57  ;;  %v1246_v19 = vadd.f32 %v2973_v8, %v1148_v28  ;;  %v1028_v2 = vmul.f32 %v1967_v22, %v995_v34  ;;  %v2979_v22 = vld [vmem:[#allocation48_spill] sm:$0xff]  ;;  %v2980_v5 = vld [vmem:[#allocation30_spill] sm:$0xff]  ;;  %v2982_v62 = vld [vmem:[#allocation49_spill] sm:$0xff] }
 0x139   : > { %v1149_v41 = vadd.f32 %v1117_v10, %v1052_v4  ;;  %v1342_v44 = vadd.f32 %v1310_v54, %v1245_v52  ;;  %v1248_v38 = vadd.f32 %v2974_v45, %v1150_v51  ;;  %v963_v9 = vadd.f32 %v931_v7, %v2628_v47  ;;  %v1287_v23 = vld [vmem:[#allocation2 + $0x1a1] sm:$0xff] }
 0x13a   : > { %v1249_v11 = vadd.f32 %v2975_v56, %v1151_v1  ;;  %v1474_v25 = vadd.f32 %v2741_v33, %v1438_v20  ;;  %v1343_v63 = vadd.f32 %v2977_v21, %v1246_v19  ;;  %v1124_v32 = vmul.f32 %v1990_v48, %v1091_v55  ;;  %v1383_v1 = vld [vmem:[#allocation2 + $0x19a] sm:$0xff]  ;;  %v1384_v20 = vld [vmem:[#allocation2 + $0x1a2] sm:$0xff] }
 0x13b   : > { %v1247_v57 = vadd.f32 %v2976_v17, %v1149_v41  ;;  %v1439_v14 = vadd.f32 %v1407_v58, %v1342_v44  ;;  %v1345_v0 = vadd.f32 %v2978_v59, %v1248_v38  ;;  %v1060_v15 = vadd.f32 %v1028_v2, %v963_v9  ;;  %v1286_v58 = vld [vmem:[#allocation2 + $0x199] sm:$0xff] }
 0x13c   : > { %v1346_v6 = vadd.f32 %v2979_v22, %v1249_v11  ;;  %v1506_v35 = vmax.f32 %v1474_v25, 0.0  ;;  %v1440_v46 = vadd.f32 %v2981_v31, %v1343_v63  ;;  %v1125_v26 = vmul.f32 %v1990_v48, %v1092_v43 }
 0x13d   : > { %v1344_v53 = vadd.f32 %v2980_v5, %v1247_v57  ;;  %v1475_v47 = vadd.f32 %v2741_v33, %v1439_v14  ;;  %v1442_v3 = vadd.f32 %v2982_v62, %v1345_v0  ;;  %v1156_v13 = vadd.f32 %v1124_v32, %v2660_v30 }
 0x13e   : > { %v1443_v10 = vadd.f32 %v2983_v39, %v1346_v6  ;;  %1539 = vst.msk [vmem:[%s2194_s12 + $0xa0] sm:$0xff] %vm1518_vm4, %v1506_v35  ;;  %v1221_v60 = vmul.f32 %v1979_v36, %v898_v24  ;;  %v1476_v50 = vadd.f32 %v2741_v33, %v1440_v46  ;;  %v1157_v27 = vadd.f32 %v1125_v26, %v1060_v15 }
 0x13f   : > { %v1441_v29 = vadd.f32 %v2984_v16, %v1344_v53  ;;  %v1507_v54 = vmax.f32 %v1475_v47, 0.0  ;;  %v1478_v48 = vadd.f32 %v2741_v33, %v1442_v3  ;;  %v1222_v28 = vmul.f32 %v1979_v36, %v1189_v42 }
 0x140   : > { %v1479_v4 = vadd.f32 %v2741_v33, %v1443_v10  ;;  %v1223_v52 = vmul.f32 %v1979_v36, %v1190_v49  ;;  %v1508_v24 = vmax.f32 %v1476_v50, 0.0  ;;  %v1253_v51 = vadd.f32 %v1221_v60, %v2632_v40 }
 0x141   : > { %v1477_v30 = vadd.f32 %v2741_v33, %v1441_v29  ;;  %1540 = vst.msk [vmem:[%s2194_s12 + $0xa8] sm:$0xff] %vm1518_vm4, %v1507_v54  ;;  %v1318_v61 = vmul.f32 %v1982_v37, %v995_v34  ;;  %v1510_v7 = vmax.f32 %v1478_v48, 0.0  ;;  %v1254_v8 = vadd.f32 %v1222_v28, %v1156_v13 }
 0x142   : > { %v1511_v41 = vmax.f32 %v1479_v4, 0.0  ;;  %v1255_v36 = vadd.f32 %v1223_v52, %v1157_v27  ;;  %1541 = vst.msk [vmem:[%s2194_s12 + $0xb0] sm:$0xff] %vm1518_vm4, %v1508_v24  ;;  %v1319_v44 = vmul.f32 %v1982_v37, %v1286_v58  ;;  %v1320_v2 = vmul.f32 %v1982_v37, %v1287_v23 }
 0x143   : > { %v1509_v19 = vmax.f32 %v1477_v30, 0.0  ;;  %v1350_v45 = vadd.f32 %v1318_v61, %v1253_v51  ;;  %1543 = vst.msk [vmem:[%s2194_s12 + $0xc0] sm:$0xff] %vm1518_vm4, %v1510_v7  ;;  %v1414_v40 = vmul.f32 %v2677_v18, %v1091_v55  ;;  %v1415_v34 = vmul.f32 %v2677_v18, %v1092_v43 }
 0x144   : > { %v1416_v38 = vmul.f32 %v2677_v18, %v1383_v1  ;;  %v1417_v56 = vmul.f32 %v2677_v18, %v1384_v20  ;;  %v1351_v11 = vadd.f32 %v1319_v44, %v1254_v8  ;;  %v1352_v25 = vadd.f32 %v1320_v2, %v1255_v36  ;;  %1544 = vst.msk [vmem:[%s2194_s12 + $0xc8] sm:$0xff] %vm1518_vm4, %v1511_v41 }
 0x145   : > { %1542 = vst.msk [vmem:[%s2194_s12 + $0xb8] sm:$0xff] %vm1518_vm4, %v1509_v19  ;;  %v1446_v37 = vadd.f32 %v1414_v40, %v2663_v12  ;;  %v1447_v9 = vadd.f32 %v1415_v34, %v1350_v45 }
 0x146   : > { %v1448_v55 = vadd.f32 %v1416_v38, %v1351_v11  ;;  %v1449_v17 = vadd.f32 %v1417_v56, %v1352_v25 }
 0x147   : > { %v1482_v43 = vadd.f32 %v2741_v33, %v1446_v37  ;;  %v1483_v57 = vadd.f32 %v2741_v33, %v1447_v9 }
 0x148   : > { %v1484_v18 = vadd.f32 %v2741_v33, %v1448_v55  ;;  %v1485_v21 = vadd.f32 %v2741_v33, %v1449_v17 }
 0x149   : > { %v1514_v63 = vmax.f32 %v1482_v43, 0.0  ;;  %v1515_v14 = vmax.f32 %v1483_v57, 0.0 }
 0x14a   : > { %v1516_v32 = vmax.f32 %v1484_v18, 0.0  ;;  %v1517_v59 = vmax.f32 %v1485_v21, 0.0 }
 0x14b   : > { %1547 = vst.msk [vmem:[%s2194_s12 + $0xe0] sm:$0xff] %vm1518_vm4, %v1514_v63 }
 0x14c   : > { %1548 = vst.msk [vmem:[%s2194_s12 + $0xe8] sm:$0xff] %vm1518_vm4, %v1515_v14 }
 0x14d   : > { %1549 = vst.msk [vmem:[%s2194_s12 + $0xf0] sm:$0xff] %vm1518_vm4, %v1516_v32 }
 0x14e   : > { %1550 = vst.msk [vmem:[%s2194_s12 + $0xf8] sm:$0xff] %vm1518_vm4, %v1517_v59 }
 0x14f PF: > { %s15_s18 = sadd.s32 1, %s1739_s18  }
 0x150   : > { %p12_p4 = scmp.ge.s32.totalorder %s15_s18, 4  }
 0x152   :  { %14 = sbr.rel (!%p12_p4) target bundleno = 1 (0x1), region = 72 }

</bundles_post_ra>
